<compile_context>
chip_gen: v7x
topology: tpu7x:2x2x1
jax: 0.10.0
libtpu: 0.0.40
codegen_flags: <defaults>
</compile_context>

<pallas_src>
import jax
import jax.numpy as jnp
from jax.experimental import pallas as pl
from jax.experimental.pallas import tpu as pltpu

KH = KW = 3
CIN = 3
COUT = 3


def conv3x3_kernel(w_ref, b_ref, x_ref, o_ref):
    """One image per grid step. Direct 3x3 VALID conv via scalar-weight FMAs.

    w_ref: (81,)          SMEM  -- OIHW-flattened conv weights
    b_ref: (COUT,)        SMEM  -- bias
    x_ref: (CIN, H, W)    VMEM  -- batch dim squeezed by the BlockSpec; W on lanes
    o_ref: (COUT, OH, OW) VMEM
    """
    cin, h, w = x_ref.shape
    cout, oh, ow = o_ref.shape

    # Hoist every SMEM scalar read (sld + scalar->vreg broadcast) to kernel entry,
    # out of the FMA chain, so the LLO scheduler can hide them.
    wk = [w_ref[i] for i in range(cout * cin * KH * KW)]
    bias = [b_ref[co] for co in range(cout)]

    # One accumulator per output channel, seeded with the broadcast bias.
    accs = [jnp.full((oh, ow), bias[co], jnp.float32) for co in range(cout)]

    # (ci, kh, kw) outer / co inner: only 1 tap + COUT accumulators live at a time,
    # each static shift (cheap sublane/lane move) is reused COUT times, and the
    # COUT independent add chains spread across the 4 VALU slots.
    for ci in range(cin):
        plane = x_ref[ci]                                     # (H, W)
        for kh in range(KH):
            for kw_ in range(KW):
                tap = plane[kh:kh + oh, kw_:kw_ + ow]         # (OH, OW) static view
                k = kh * KW + kw_
                for co in range(cout):
                    accs[co] = accs[co] + wk[(co * cin + ci) * (KH * KW) + k] * tap

    for co in range(cout):
        o_ref[co] = accs[co].astype(o_ref.dtype)


def conv2d_pallas_nchw(x_nchw, w_oihw, b):
    """x: (N, CIN, H, W); w: (COUT, CIN, KH, KW); b: (COUT,). Returns NCHW output."""
    n, cin, h, w = x_nchw.shape
    assert cin == CIN
    oh, ow = h - KH + 1, w - KW + 1

    x32 = x_nchw.astype(jnp.float32)
    w_flat = w_oihw.astype(jnp.float32).reshape(-1)           # (81,), OIHW order
    b1 = b.astype(jnp.float32)                                 # (COUT,)

    flops = 2 * n * oh * ow * COUT * CIN * KH * KW
    bytes_accessed = 4 * (x32.size + w_flat.size + b1.size + n * COUT * oh * ow)

    return pl.pallas_call(
        conv3x3_kernel,
        out_shape=jax.ShapeDtypeStruct((n, COUT, oh, ow), jnp.float32),
        grid=(n,),
        in_specs=[
            pl.BlockSpec(memory_space=pltpu.MemorySpace.SMEM),          # weights
            pl.BlockSpec(memory_space=pltpu.MemorySpace.SMEM),          # bias
            pl.BlockSpec((None, CIN, h, w), lambda i: (i, 0, 0, 0)),    # one image
        ],
        out_specs=pl.BlockSpec((None, COUT, oh, ow), lambda i: (i, 0, 0, 0)),
        compiler_params=pltpu.CompilerParams(
            dimension_semantics=("parallel",),      # megacore-shard the batch (v7x)
        ),
        cost_estimate=pl.CostEstimate(
            flops=flops, transcendentals=0, bytes_accessed=bytes_accessed),
    )(w_flat, b1, x32)


def model_forward(x_nchw, w_oihw, b):
    """PyTorch-semantics entry point: NCHW in, NCHW out."""
    return conv2d_pallas_nchw(x_nchw, w_oihw, b)


def init_params(key):
    """Deterministic init matching nn.Conv2d(3, 3, 3) default (kaiming-uniform style)."""
    kw_key, kb_key = jax.random.split(key)
    fan_in = CIN * KH * KW
    bound = 1.0 / jnp.sqrt(fan_in)
    w = jax.random.uniform(kw_key, (COUT, CIN, KH, KW), jnp.float32, -bound, bound)
    b = jax.random.uniform(kb_key, (COUT,), jnp.float32, -bound, bound)
    return w, b


if __name__ == "__main__":
    key = jax.random.PRNGKey(0)
    k_x, k_p = jax.random.split(key)

    N, C, H, W = 2, 3, 16, 16
    x = jax.random.normal(k_x, (N, C, H, W), jnp.float32)
    w, b = init_params(k_p)

    y = model_forward(x, w, b)
    y = jax.block_until_ready(y)

    # Cross-check against XLA's native conv (same semantics as torch Conv2d, VALID pad).
    y_ref = jax.lax.conv_general_dilated(
        x, w, window_strides=(1, 1), padding="VALID",
        dimension_numbers=("NCHW", "OIHW", "NCHW")) + b.reshape(1, COUT, 1, 1)
    assert y.shape == (N, COUT, H - 2, W - 2)
    assert jnp.allclose(y, y_ref, atol=1e-5, rtol=1e-5)

    print("KERNEL_OK")
</pallas_src>

<mosaic_0001>
module attributes {stable_mosaic.version = 11 : i64} {
  func.func @conv3x3_kernel(%arg0: i32, %arg1: memref<81xf32, #tpu.memory_space<smem>>, %arg2: memref<3xf32, #tpu.memory_space<smem>>, %arg3: memref<1x3x16x16xf32, #tpu.memory_space<vmem>>, %arg4: memref<1x3x14x14xf32, #tpu.memory_space<vmem>>) attributes {dimension_semantics = [#tpu.dimension_semantics<parallel>], iteration_bounds = array<i64: 2>, scalar_prefetch = 0 : i64, scratch_operands = 0 : i64, tpu.core_type = #tpu.core_type<tc>, window_params = [{transform_indices = @transform_0, window_bounds = array<i64: 81>}, {transform_indices = @transform_1, window_bounds = array<i64: 3>}, {transform_indices = @transform_2, window_bounds = array<i64: 1, 3, 16, 16>}, {transform_indices = @transform_3, window_bounds = array<i64: 1, 3, 14, 14>}]} {
    %c0 = arith.constant 0 : index
    %0 = memref.load %arg1[%c0] : memref<81xf32, #tpu.memory_space<smem>>
    %c1 = arith.constant 1 : index
    %1 = memref.load %arg1[%c1] : memref<81xf32, #tpu.memory_space<smem>>
    %c2 = arith.constant 2 : index
    %2 = memref.load %arg1[%c2] : memref<81xf32, #tpu.memory_space<smem>>
    %c3 = arith.constant 3 : index
    %3 = memref.load %arg1[%c3] : memref<81xf32, #tpu.memory_space<smem>>
    %c4 = arith.constant 4 : index
    %4 = memref.load %arg1[%c4] : memref<81xf32, #tpu.memory_space<smem>>
    %c5 = arith.constant 5 : index
    %5 = memref.load %arg1[%c5] : memref<81xf32, #tpu.memory_space<smem>>
    %c6 = arith.constant 6 : index
    %6 = memref.load %arg1[%c6] : memref<81xf32, #tpu.memory_space<smem>>
    %c7 = arith.constant 7 : index
    %7 = memref.load %arg1[%c7] : memref<81xf32, #tpu.memory_space<smem>>
    %c8 = arith.constant 8 : index
    %8 = memref.load %arg1[%c8] : memref<81xf32, #tpu.memory_space<smem>>
    %c9 = arith.constant 9 : index
    %9 = memref.load %arg1[%c9] : memref<81xf32, #tpu.memory_space<smem>>
    %c10 = arith.constant 10 : index
    %10 = memref.load %arg1[%c10] : memref<81xf32, #tpu.memory_space<smem>>
    %c11 = arith.constant 11 : index
    %11 = memref.load %arg1[%c11] : memref<81xf32, #tpu.memory_space<smem>>
    %c12 = arith.constant 12 : index
    %12 = memref.load %arg1[%c12] : memref<81xf32, #tpu.memory_space<smem>>
    %c13 = arith.constant 13 : index
    %13 = memref.load %arg1[%c13] : memref<81xf32, #tpu.memory_space<smem>>
    %c14 = arith.constant 14 : index
    %14 = memref.load %arg1[%c14] : memref<81xf32, #tpu.memory_space<smem>>
    %c15 = arith.constant 15 : index
    %15 = memref.load %arg1[%c15] : memref<81xf32, #tpu.memory_space<smem>>
    %c16 = arith.constant 16 : index
    %16 = memref.load %arg1[%c16] : memref<81xf32, #tpu.memory_space<smem>>
    %c17 = arith.constant 17 : index
    %17 = memref.load %arg1[%c17] : memref<81xf32, #tpu.memory_space<smem>>
    %c18 = arith.constant 18 : index
    %18 = memref.load %arg1[%c18] : memref<81xf32, #tpu.memory_space<smem>>
    %c19 = arith.constant 19 : index
    %19 = memref.load %arg1[%c19] : memref<81xf32, #tpu.memory_space<smem>>
    %c20 = arith.constant 20 : index
    %20 = memref.load %arg1[%c20] : memref<81xf32, #tpu.memory_space<smem>>
    %c21 = arith.constant 21 : index
    %21 = memref.load %arg1[%c21] : memref<81xf32, #tpu.memory_space<smem>>
    %c22 = arith.constant 22 : index
    %22 = memref.load %arg1[%c22] : memref<81xf32, #tpu.memory_space<smem>>
    %c23 = arith.constant 23 : index
    %23 = memref.load %arg1[%c23] : memref<81xf32, #tpu.memory_space<smem>>
    %c24 = arith.constant 24 : index
    %24 = memref.load %arg1[%c24] : memref<81xf32, #tpu.memory_space<smem>>
    %c25 = arith.constant 25 : index
    %25 = memref.load %arg1[%c25] : memref<81xf32, #tpu.memory_space<smem>>
    %c26 = arith.constant 26 : index
    %26 = memref.load %arg1[%c26] : memref<81xf32, #tpu.memory_space<smem>>
    %c27 = arith.constant 27 : index
    %27 = memref.load %arg1[%c27] : memref<81xf32, #tpu.memory_space<smem>>
    %c28 = arith.constant 28 : index
    %28 = memref.load %arg1[%c28] : memref<81xf32, #tpu.memory_space<smem>>
    %c29 = arith.constant 29 : index
    %29 = memref.load %arg1[%c29] : memref<81xf32, #tpu.memory_space<smem>>
    %c30 = arith.constant 30 : index
    %30 = memref.load %arg1[%c30] : memref<81xf32, #tpu.memory_space<smem>>
    %c31 = arith.constant 31 : index
    %31 = memref.load %arg1[%c31] : memref<81xf32, #tpu.memory_space<smem>>
    %c32 = arith.constant 32 : index
    %32 = memref.load %arg1[%c32] : memref<81xf32, #tpu.memory_space<smem>>
    %c33 = arith.constant 33 : index
    %33 = memref.load %arg1[%c33] : memref<81xf32, #tpu.memory_space<smem>>
    %c34 = arith.constant 34 : index
    %34 = memref.load %arg1[%c34] : memref<81xf32, #tpu.memory_space<smem>>
    %c35 = arith.constant 35 : index
    %35 = memref.load %arg1[%c35] : memref<81xf32, #tpu.memory_space<smem>>
    %c36 = arith.constant 36 : index
    %36 = memref.load %arg1[%c36] : memref<81xf32, #tpu.memory_space<smem>>
    %c37 = arith.constant 37 : index
    %37 = memref.load %arg1[%c37] : memref<81xf32, #tpu.memory_space<smem>>
    %c38 = arith.constant 38 : index
    %38 = memref.load %arg1[%c38] : memref<81xf32, #tpu.memory_space<smem>>
    %c39 = arith.constant 39 : index
    %39 = memref.load %arg1[%c39] : memref<81xf32, #tpu.memory_space<smem>>
    %c40 = arith.constant 40 : index
    %40 = memref.load %arg1[%c40] : memref<81xf32, #tpu.memory_space<smem>>
    %c41 = arith.constant 41 : index
    %41 = memref.load %arg1[%c41] : memref<81xf32, #tpu.memory_space<smem>>
    %c42 = arith.constant 42 : index
    %42 = memref.load %arg1[%c42] : memref<81xf32, #tpu.memory_space<smem>>
    %c43 = arith.constant 43 : index
    %43 = memref.load %arg1[%c43] : memref<81xf32, #tpu.memory_space<smem>>
    %c44 = arith.constant 44 : index
    %44 = memref.load %arg1[%c44] : memref<81xf32, #tpu.memory_space<smem>>
    %c45 = arith.constant 45 : index
    %45 = memref.load %arg1[%c45] : memref<81xf32, #tpu.memory_space<smem>>
    %c46 = arith.constant 46 : index
    %46 = memref.load %arg1[%c46] : memref<81xf32, #tpu.memory_space<smem>>
    %c47 = arith.constant 47 : index
    %47 = memref.load %arg1[%c47] : memref<81xf32, #tpu.memory_space<smem>>
    %c48 = arith.constant 48 : index
    %48 = memref.load %arg1[%c48] : memref<81xf32, #tpu.memory_space<smem>>
    %c49 = arith.constant 49 : index
    %49 = memref.load %arg1[%c49] : memref<81xf32, #tpu.memory_space<smem>>
    %c50 = arith.constant 50 : index
    %50 = memref.load %arg1[%c50] : memref<81xf32, #tpu.memory_space<smem>>
    %c51 = arith.constant 51 : index
    %51 = memref.load %arg1[%c51] : memref<81xf32, #tpu.memory_space<smem>>
    %c52 = arith.constant 52 : index
    %52 = memref.load %arg1[%c52] : memref<81xf32, #tpu.memory_space<smem>>
    %c53 = arith.constant 53 : index
    %53 = memref.load %arg1[%c53] : memref<81xf32, #tpu.memory_space<smem>>
    %c54 = arith.constant 54 : index
    %54 = memref.load %arg1[%c54] : memref<81xf32, #tpu.memory_space<smem>>
    %c55 = arith.constant 55 : index
    %55 = memref.load %arg1[%c55] : memref<81xf32, #tpu.memory_space<smem>>
    %c56 = arith.constant 56 : index
    %56 = memref.load %arg1[%c56] : memref<81xf32, #tpu.memory_space<smem>>
    %c57 = arith.constant 57 : index
    %57 = memref.load %arg1[%c57] : memref<81xf32, #tpu.memory_space<smem>>
    %c58 = arith.constant 58 : index
    %58 = memref.load %arg1[%c58] : memref<81xf32, #tpu.memory_space<smem>>
    %c59 = arith.constant 59 : index
    %59 = memref.load %arg1[%c59] : memref<81xf32, #tpu.memory_space<smem>>
    %c60 = arith.constant 60 : index
    %60 = memref.load %arg1[%c60] : memref<81xf32, #tpu.memory_space<smem>>
    %c61 = arith.constant 61 : index
    %61 = memref.load %arg1[%c61] : memref<81xf32, #tpu.memory_space<smem>>
    %c62 = arith.constant 62 : index
    %62 = memref.load %arg1[%c62] : memref<81xf32, #tpu.memory_space<smem>>
    %c63 = arith.constant 63 : index
    %63 = memref.load %arg1[%c63] : memref<81xf32, #tpu.memory_space<smem>>
    %c64 = arith.constant 64 : index
    %64 = memref.load %arg1[%c64] : memref<81xf32, #tpu.memory_space<smem>>
    %c65 = arith.constant 65 : index
    %65 = memref.load %arg1[%c65] : memref<81xf32, #tpu.memory_space<smem>>
    %c66 = arith.constant 66 : index
    %66 = memref.load %arg1[%c66] : memref<81xf32, #tpu.memory_space<smem>>
    %c67 = arith.constant 67 : index
    %67 = memref.load %arg1[%c67] : memref<81xf32, #tpu.memory_space<smem>>
    %c68 = arith.constant 68 : index
    %68 = memref.load %arg1[%c68] : memref<81xf32, #tpu.memory_space<smem>>
    %c69 = arith.constant 69 : index
    %69 = memref.load %arg1[%c69] : memref<81xf32, #tpu.memory_space<smem>>
    %c70 = arith.constant 70 : index
    %70 = memref.load %arg1[%c70] : memref<81xf32, #tpu.memory_space<smem>>
    %c71 = arith.constant 71 : index
    %71 = memref.load %arg1[%c71] : memref<81xf32, #tpu.memory_space<smem>>
    %c72 = arith.constant 72 : index
    %72 = memref.load %arg1[%c72] : memref<81xf32, #tpu.memory_space<smem>>
    %c73 = arith.constant 73 : index
    %73 = memref.load %arg1[%c73] : memref<81xf32, #tpu.memory_space<smem>>
    %c74 = arith.constant 74 : index
    %74 = memref.load %arg1[%c74] : memref<81xf32, #tpu.memory_space<smem>>
    %c75 = arith.constant 75 : index
    %75 = memref.load %arg1[%c75] : memref<81xf32, #tpu.memory_space<smem>>
    %c76 = arith.constant 76 : index
    %76 = memref.load %arg1[%c76] : memref<81xf32, #tpu.memory_space<smem>>
    %c77 = arith.constant 77 : index
    %77 = memref.load %arg1[%c77] : memref<81xf32, #tpu.memory_space<smem>>
    %c78 = arith.constant 78 : index
    %78 = memref.load %arg1[%c78] : memref<81xf32, #tpu.memory_space<smem>>
    %c79 = arith.constant 79 : index
    %79 = memref.load %arg1[%c79] : memref<81xf32, #tpu.memory_space<smem>>
    %c80 = arith.constant 80 : index
    %80 = memref.load %arg1[%c80] : memref<81xf32, #tpu.memory_space<smem>>
    %c0_0 = arith.constant 0 : index
    %81 = memref.load %arg2[%c0_0] : memref<3xf32, #tpu.memory_space<smem>>
    %c1_1 = arith.constant 1 : index
    %82 = memref.load %arg2[%c1_1] : memref<3xf32, #tpu.memory_space<smem>>
    %c2_2 = arith.constant 2 : index
    %83 = memref.load %arg2[%c2_2] : memref<3xf32, #tpu.memory_space<smem>>
    %84 = vector.broadcast %81 : f32 to vector<14x14xf32>
    %85 = vector.broadcast %82 : f32 to vector<14x14xf32>
    %86 = vector.broadcast %83 : f32 to vector<14x14xf32>
    %c0_3 = arith.constant 0 : index
    %c0_4 = arith.constant 0 : index
    %c0_5 = arith.constant 0 : index
    %c0_6 = arith.constant 0 : index
    %87 = vector.load %arg3[%c0_3, %c0_4, %c0_5, %c0_6] : memref<1x3x16x16xf32, #tpu.memory_space<vmem>>, vector<1x1x16x16xf32>
    %88 = vector.shape_cast %87 : vector<1x1x16x16xf32> to vector<16x16xf32>
    %89 = vector.extract_strided_slice %88 {offsets = [0, 0], sizes = [14, 14], strides = [1, 1]} : vector<16x16xf32> to vector<14x14xf32>
    %90 = vector.broadcast %0 : f32 to vector<14x14xf32>
    %91 = arith.mulf %90, %89 : vector<14x14xf32>
    %92 = arith.addf %84, %91 : vector<14x14xf32>
    %93 = vector.broadcast %27 : f32 to vector<14x14xf32>
    %94 = arith.mulf %93, %89 : vector<14x14xf32>
    %95 = arith.addf %85, %94 : vector<14x14xf32>
    %96 = vector.broadcast %54 : f32 to vector<14x14xf32>
    %97 = arith.mulf %96, %89 : vector<14x14xf32>
    %98 = arith.addf %86, %97 : vector<14x14xf32>
    %99 = vector.extract_strided_slice %88 {offsets = [0, 1], sizes = [14, 14], strides = [1, 1]} : vector<16x16xf32> to vector<14x14xf32>
    %100 = vector.broadcast %1 : f32 to vector<14x14xf32>
    %101 = arith.mulf %100, %99 : vector<14x14xf32>
    %102 = arith.addf %92, %101 : vector<14x14xf32>
    %103 = vector.broadcast %28 : f32 to vector<14x14xf32>
    %104 = arith.mulf %103, %99 : vector<14x14xf32>
    %105 = arith.addf %95, %104 : vector<14x14xf32>
    %106 = vector.broadcast %55 : f32 to vector<14x14xf32>
    %107 = arith.mulf %106, %99 : vector<14x14xf32>
    %108 = arith.addf %98, %107 : vector<14x14xf32>
    %109 = vector.extract_strided_slice %88 {offsets = [0, 2], sizes = [14, 14], strides = [1, 1]} : vector<16x16xf32> to vector<14x14xf32>
    %110 = vector.broadcast %2 : f32 to vector<14x14xf32>
    %111 = arith.mulf %110, %109 : vector<14x14xf32>
    %112 = arith.addf %102, %111 : vector<14x14xf32>
    %113 = vector.broadcast %29 : f32 to vector<14x14xf32>
    %114 = arith.mulf %113, %109 : vector<14x14xf32>
    %115 = arith.addf %105, %114 : vector<14x14xf32>
    %116 = vector.broadcast %56 : f32 to vector<14x14xf32>
    %117 = arith.mulf %116, %109 : vector<14x14xf32>
    %118 = arith.addf %108, %117 : vector<14x14xf32>
    %119 = vector.extract_strided_slice %88 {offsets = [1, 0], sizes = [14, 14], strides = [1, 1]} : vector<16x16xf32> to vector<14x14xf32>
    %120 = vector.broadcast %3 : f32 to vector<14x14xf32>
    %121 = arith.mulf %120, %119 : vector<14x14xf32>
    %122 = arith.addf %112, %121 : vector<14x14xf32>
    %123 = vector.broadcast %30 : f32 to vector<14x14xf32>
    %124 = arith.mulf %123, %119 : vector<14x14xf32>
    %125 = arith.addf %115, %124 : vector<14x14xf32>
    %126 = vector.broadcast %57 : f32 to vector<14x14xf32>
    %127 = arith.mulf %126, %119 : vector<14x14xf32>
    %128 = arith.addf %118, %127 : vector<14x14xf32>
    %129 = vector.extract_strided_slice %88 {offsets = [1, 1], sizes = [14, 14], strides = [1, 1]} : vector<16x16xf32> to vector<14x14xf32>
    %130 = vector.broadcast %4 : f32 to vector<14x14xf32>
    %131 = arith.mulf %130, %129 : vector<14x14xf32>
    %132 = arith.addf %122, %131 : vector<14x14xf32>
    %133 = vector.broadcast %31 : f32 to vector<14x14xf32>
    %134 = arith.mulf %133, %129 : vector<14x14xf32>
    %135 = arith.addf %125, %134 : vector<14x14xf32>
    %136 = vector.broadcast %58 : f32 to vector<14x14xf32>
    %137 = arith.mulf %136, %129 : vector<14x14xf32>
    %138 = arith.addf %128, %137 : vector<14x14xf32>
    %139 = vector.extract_strided_slice %88 {offsets = [1, 2], sizes = [14, 14], strides = [1, 1]} : vector<16x16xf32> to vector<14x14xf32>
    %140 = vector.broadcast %5 : f32 to vector<14x14xf32>
    %141 = arith.mulf %140, %139 : vector<14x14xf32>
    %142 = arith.addf %132, %141 : vector<14x14xf32>
    %143 = vector.broadcast %32 : f32 to vector<14x14xf32>
    %144 = arith.mulf %143, %139 : vector<14x14xf32>
    %145 = arith.addf %135, %144 : vector<14x14xf32>
    %146 = vector.broadcast %59 : f32 to vector<14x14xf32>
    %147 = arith.mulf %146, %139 : vector<14x14xf32>
    %148 = arith.addf %138, %147 : vector<14x14xf32>
    %149 = vector.extract_strided_slice %88 {offsets = [2, 0], sizes = [14, 14], strides = [1, 1]} : vector<16x16xf32> to vector<14x14xf32>
    %150 = vector.broadcast %6 : f32 to vector<14x14xf32>
    %151 = arith.mulf %150, %149 : vector<14x14xf32>
    %152 = arith.addf %142, %151 : vector<14x14xf32>
    %153 = vector.broadcast %33 : f32 to vector<14x14xf32>
    %154 = arith.mulf %153, %149 : vector<14x14xf32>
    %155 = arith.addf %145, %154 : vector<14x14xf32>
    %156 = vector.broadcast %60 : f32 to vector<14x14xf32>
    %157 = arith.mulf %156, %149 : vector<14x14xf32>
    %158 = arith.addf %148, %157 : vector<14x14xf32>
    %159 = vector.extract_strided_slice %88 {offsets = [2, 1], sizes = [14, 14], strides = [1, 1]} : vector<16x16xf32> to vector<14x14xf32>
    %160 = vector.broadcast %7 : f32 to vector<14x14xf32>
    %161 = arith.mulf %160, %159 : vector<14x14xf32>
    %162 = arith.addf %152, %161 : vector<14x14xf32>
    %163 = vector.broadcast %34 : f32 to vector<14x14xf32>
    %164 = arith.mulf %163, %159 : vector<14x14xf32>
    %165 = arith.addf %155, %164 : vector<14x14xf32>
    %166 = vector.broadcast %61 : f32 to vector<14x14xf32>
    %167 = arith.mulf %166, %159 : vector<14x14xf32>
    %168 = arith.addf %158, %167 : vector<14x14xf32>
    %169 = vector.extract_strided_slice %88 {offsets = [2, 2], sizes = [14, 14], strides = [1, 1]} : vector<16x16xf32> to vector<14x14xf32>
    %170 = vector.broadcast %8 : f32 to vector<14x14xf32>
    %171 = arith.mulf %170, %169 : vector<14x14xf32>
    %172 = arith.addf %162, %171 : vector<14x14xf32>
    %173 = vector.broadcast %35 : f32 to vector<14x14xf32>
    %174 = arith.mulf %173, %169 : vector<14x14xf32>
    %175 = arith.addf %165, %174 : vector<14x14xf32>
    %176 = vector.broadcast %62 : f32 to vector<14x14xf32>
    %177 = arith.mulf %176, %169 : vector<14x14xf32>
    %178 = arith.addf %168, %177 : vector<14x14xf32>
    %c0_7 = arith.constant 0 : index
    %c1_8 = arith.constant 1 : index
    %c0_9 = arith.constant 0 : index
    %c0_10 = arith.constant 0 : index
    %179 = vector.load %arg3[%c0_7, %c1_8, %c0_9, %c0_10] : memref<1x3x16x16xf32, #tpu.memory_space<vmem>>, vector<1x1x16x16xf32>
    %180 = vector.shape_cast %179 : vector<1x1x16x16xf32> to vector<16x16xf32>
    %181 = vector.extract_strided_slice %180 {offsets = [0, 0], sizes = [14, 14], strides = [1, 1]} : vector<16x16xf32> to vector<14x14xf32>
    %182 = vector.broadcast %9 : f32 to vector<14x14xf32>
    %183 = arith.mulf %182, %181 : vector<14x14xf32>
    %184 = arith.addf %172, %183 : vector<14x14xf32>
    %185 = vector.broadcast %36 : f32 to vector<14x14xf32>
    %186 = arith.mulf %185, %181 : vector<14x14xf32>
    %187 = arith.addf %175, %186 : vector<14x14xf32>
    %188 = vector.broadcast %63 : f32 to vector<14x14xf32>
    %189 = arith.mulf %188, %181 : vector<14x14xf32>
    %190 = arith.addf %178, %189 : vector<14x14xf32>
    %191 = vector.extract_strided_slice %180 {offsets = [0, 1], sizes = [14, 14], strides = [1, 1]} : vector<16x16xf32> to vector<14x14xf32>
    %192 = vector.broadcast %10 : f32 to vector<14x14xf32>
    %193 = arith.mulf %192, %191 : vector<14x14xf32>
    %194 = arith.addf %184, %193 : vector<14x14xf32>
    %195 = vector.broadcast %37 : f32 to vector<14x14xf32>
    %196 = arith.mulf %195, %191 : vector<14x14xf32>
    %197 = arith.addf %187, %196 : vector<14x14xf32>
    %198 = vector.broadcast %64 : f32 to vector<14x14xf32>
    %199 = arith.mulf %198, %191 : vector<14x14xf32>
    %200 = arith.addf %190, %199 : vector<14x14xf32>
    %201 = vector.extract_strided_slice %180 {offsets = [0, 2], sizes = [14, 14], strides = [1, 1]} : vector<16x16xf32> to vector<14x14xf32>
    %202 = vector.broadcast %11 : f32 to vector<14x14xf32>
    %203 = arith.mulf %202, %201 : vector<14x14xf32>
    %204 = arith.addf %194, %203 : vector<14x14xf32>
    %205 = vector.broadcast %38 : f32 to vector<14x14xf32>
    %206 = arith.mulf %205, %201 : vector<14x14xf32>
    %207 = arith.addf %197, %206 : vector<14x14xf32>
    %208 = vector.broadcast %65 : f32 to vector<14x14xf32>
    %209 = arith.mulf %208, %201 : vector<14x14xf32>
    %210 = arith.addf %200, %209 : vector<14x14xf32>
    %211 = vector.extract_strided_slice %180 {offsets = [1, 0], sizes = [14, 14], strides = [1, 1]} : vector<16x16xf32> to vector<14x14xf32>
    %212 = vector.broadcast %12 : f32 to vector<14x14xf32>
    %213 = arith.mulf %212, %211 : vector<14x14xf32>
    %214 = arith.addf %204, %213 : vector<14x14xf32>
    %215 = vector.broadcast %39 : f32 to vector<14x14xf32>
    %216 = arith.mulf %215, %211 : vector<14x14xf32>
    %217 = arith.addf %207, %216 : vector<14x14xf32>
    %218 = vector.broadcast %66 : f32 to vector<14x14xf32>
    %219 = arith.mulf %218, %211 : vector<14x14xf32>
    %220 = arith.addf %210, %219 : vector<14x14xf32>
    %221 = vector.extract_strided_slice %180 {offsets = [1, 1], sizes = [14, 14], strides = [1, 1]} : vector<16x16xf32> to vector<14x14xf32>
    %222 = vector.broadcast %13 : f32 to vector<14x14xf32>
    %223 = arith.mulf %222, %221 : vector<14x14xf32>
    %224 = arith.addf %214, %223 : vector<14x14xf32>
    %225 = vector.broadcast %40 : f32 to vector<14x14xf32>
    %226 = arith.mulf %225, %221 : vector<14x14xf32>
    %227 = arith.addf %217, %226 : vector<14x14xf32>
    %228 = vector.broadcast %67 : f32 to vector<14x14xf32>
    %229 = arith.mulf %228, %221 : vector<14x14xf32>
    %230 = arith.addf %220, %229 : vector<14x14xf32>
    %231 = vector.extract_strided_slice %180 {offsets = [1, 2], sizes = [14, 14], strides = [1, 1]} : vector<16x16xf32> to vector<14x14xf32>
    %232 = vector.broadcast %14 : f32 to vector<14x14xf32>
    %233 = arith.mulf %232, %231 : vector<14x14xf32>
    %234 = arith.addf %224, %233 : vector<14x14xf32>
    %235 = vector.broadcast %41 : f32 to vector<14x14xf32>
    %236 = arith.mulf %235, %231 : vector<14x14xf32>
    %237 = arith.addf %227, %236 : vector<14x14xf32>
    %238 = vector.broadcast %68 : f32 to vector<14x14xf32>
    %239 = arith.mulf %238, %231 : vector<14x14xf32>
    %240 = arith.addf %230, %239 : vector<14x14xf32>
    %241 = vector.extract_strided_slice %180 {offsets = [2, 0], sizes = [14, 14], strides = [1, 1]} : vector<16x16xf32> to vector<14x14xf32>
    %242 = vector.broadcast %15 : f32 to vector<14x14xf32>
    %243 = arith.mulf %242, %241 : vector<14x14xf32>
    %244 = arith.addf %234, %243 : vector<14x14xf32>
    %245 = vector.broadcast %42 : f32 to vector<14x14xf32>
    %246 = arith.mulf %245, %241 : vector<14x14xf32>
    %247 = arith.addf %237, %246 : vector<14x14xf32>
    %248 = vector.broadcast %69 : f32 to vector<14x14xf32>
    %249 = arith.mulf %248, %241 : vector<14x14xf32>
    %250 = arith.addf %240, %249 : vector<14x14xf32>
    %251 = vector.extract_strided_slice %180 {offsets = [2, 1], sizes = [14, 14], strides = [1, 1]} : vector<16x16xf32> to vector<14x14xf32>
    %252 = vector.broadcast %16 : f32 to vector<14x14xf32>
    %253 = arith.mulf %252, %251 : vector<14x14xf32>
    %254 = arith.addf %244, %253 : vector<14x14xf32>
    %255 = vector.broadcast %43 : f32 to vector<14x14xf32>
    %256 = arith.mulf %255, %251 : vector<14x14xf32>
    %257 = arith.addf %247, %256 : vector<14x14xf32>
    %258 = vector.broadcast %70 : f32 to vector<14x14xf32>
    %259 = arith.mulf %258, %251 : vector<14x14xf32>
    %260 = arith.addf %250, %259 : vector<14x14xf32>
    %261 = vector.extract_strided_slice %180 {offsets = [2, 2], sizes = [14, 14], strides = [1, 1]} : vector<16x16xf32> to vector<14x14xf32>
    %262 = vector.broadcast %17 : f32 to vector<14x14xf32>
    %263 = arith.mulf %262, %261 : vector<14x14xf32>
    %264 = arith.addf %254, %263 : vector<14x14xf32>
    %265 = vector.broadcast %44 : f32 to vector<14x14xf32>
    %266 = arith.mulf %265, %261 : vector<14x14xf32>
    %267 = arith.addf %257, %266 : vector<14x14xf32>
    %268 = vector.broadcast %71 : f32 to vector<14x14xf32>
    %269 = arith.mulf %268, %261 : vector<14x14xf32>
    %270 = arith.addf %260, %269 : vector<14x14xf32>
    %c0_11 = arith.constant 0 : index
    %c2_12 = arith.constant 2 : index
    %c0_13 = arith.constant 0 : index
    %c0_14 = arith.constant 0 : index
    %271 = vector.load %arg3[%c0_11, %c2_12, %c0_13, %c0_14] : memref<1x3x16x16xf32, #tpu.memory_space<vmem>>, vector<1x1x16x16xf32>
    %272 = vector.shape_cast %271 : vector<1x1x16x16xf32> to vector<16x16xf32>
    %273 = vector.extract_strided_slice %272 {offsets = [0, 0], sizes = [14, 14], strides = [1, 1]} : vector<16x16xf32> to vector<14x14xf32>
    %274 = vector.broadcast %18 : f32 to vector<14x14xf32>
    %275 = arith.mulf %274, %273 : vector<14x14xf32>
    %276 = arith.addf %264, %275 : vector<14x14xf32>
    %277 = vector.broadcast %45 : f32 to vector<14x14xf32>
    %278 = arith.mulf %277, %273 : vector<14x14xf32>
    %279 = arith.addf %267, %278 : vector<14x14xf32>
    %280 = vector.broadcast %72 : f32 to vector<14x14xf32>
    %281 = arith.mulf %280, %273 : vector<14x14xf32>
    %282 = arith.addf %270, %281 : vector<14x14xf32>
    %283 = vector.extract_strided_slice %272 {offsets = [0, 1], sizes = [14, 14], strides = [1, 1]} : vector<16x16xf32> to vector<14x14xf32>
    %284 = vector.broadcast %19 : f32 to vector<14x14xf32>
    %285 = arith.mulf %284, %283 : vector<14x14xf32>
    %286 = arith.addf %276, %285 : vector<14x14xf32>
    %287 = vector.broadcast %46 : f32 to vector<14x14xf32>
    %288 = arith.mulf %287, %283 : vector<14x14xf32>
    %289 = arith.addf %279, %288 : vector<14x14xf32>
    %290 = vector.broadcast %73 : f32 to vector<14x14xf32>
    %291 = arith.mulf %290, %283 : vector<14x14xf32>
    %292 = arith.addf %282, %291 : vector<14x14xf32>
    %293 = vector.extract_strided_slice %272 {offsets = [0, 2], sizes = [14, 14], strides = [1, 1]} : vector<16x16xf32> to vector<14x14xf32>
    %294 = vector.broadcast %20 : f32 to vector<14x14xf32>
    %295 = arith.mulf %294, %293 : vector<14x14xf32>
    %296 = arith.addf %286, %295 : vector<14x14xf32>
    %297 = vector.broadcast %47 : f32 to vector<14x14xf32>
    %298 = arith.mulf %297, %293 : vector<14x14xf32>
    %299 = arith.addf %289, %298 : vector<14x14xf32>
    %300 = vector.broadcast %74 : f32 to vector<14x14xf32>
    %301 = arith.mulf %300, %293 : vector<14x14xf32>
    %302 = arith.addf %292, %301 : vector<14x14xf32>
    %303 = vector.extract_strided_slice %272 {offsets = [1, 0], sizes = [14, 14], strides = [1, 1]} : vector<16x16xf32> to vector<14x14xf32>
    %304 = vector.broadcast %21 : f32 to vector<14x14xf32>
    %305 = arith.mulf %304, %303 : vector<14x14xf32>
    %306 = arith.addf %296, %305 : vector<14x14xf32>
    %307 = vector.broadcast %48 : f32 to vector<14x14xf32>
    %308 = arith.mulf %307, %303 : vector<14x14xf32>
    %309 = arith.addf %299, %308 : vector<14x14xf32>
    %310 = vector.broadcast %75 : f32 to vector<14x14xf32>
    %311 = arith.mulf %310, %303 : vector<14x14xf32>
    %312 = arith.addf %302, %311 : vector<14x14xf32>
    %313 = vector.extract_strided_slice %272 {offsets = [1, 1], sizes = [14, 14], strides = [1, 1]} : vector<16x16xf32> to vector<14x14xf32>
    %314 = vector.broadcast %22 : f32 to vector<14x14xf32>
    %315 = arith.mulf %314, %313 : vector<14x14xf32>
    %316 = arith.addf %306, %315 : vector<14x14xf32>
    %317 = vector.broadcast %49 : f32 to vector<14x14xf32>
    %318 = arith.mulf %317, %313 : vector<14x14xf32>
    %319 = arith.addf %309, %318 : vector<14x14xf32>
    %320 = vector.broadcast %76 : f32 to vector<14x14xf32>
    %321 = arith.mulf %320, %313 : vector<14x14xf32>
    %322 = arith.addf %312, %321 : vector<14x14xf32>
    %323 = vector.extract_strided_slice %272 {offsets = [1, 2], sizes = [14, 14], strides = [1, 1]} : vector<16x16xf32> to vector<14x14xf32>
    %324 = vector.broadcast %23 : f32 to vector<14x14xf32>
    %325 = arith.mulf %324, %323 : vector<14x14xf32>
    %326 = arith.addf %316, %325 : vector<14x14xf32>
    %327 = vector.broadcast %50 : f32 to vector<14x14xf32>
    %328 = arith.mulf %327, %323 : vector<14x14xf32>
    %329 = arith.addf %319, %328 : vector<14x14xf32>
    %330 = vector.broadcast %77 : f32 to vector<14x14xf32>
    %331 = arith.mulf %330, %323 : vector<14x14xf32>
    %332 = arith.addf %322, %331 : vector<14x14xf32>
    %333 = vector.extract_strided_slice %272 {offsets = [2, 0], sizes = [14, 14], strides = [1, 1]} : vector<16x16xf32> to vector<14x14xf32>
    %334 = vector.broadcast %24 : f32 to vector<14x14xf32>
    %335 = arith.mulf %334, %333 : vector<14x14xf32>
    %336 = arith.addf %326, %335 : vector<14x14xf32>
    %337 = vector.broadcast %51 : f32 to vector<14x14xf32>
    %338 = arith.mulf %337, %333 : vector<14x14xf32>
    %339 = arith.addf %329, %338 : vector<14x14xf32>
    %340 = vector.broadcast %78 : f32 to vector<14x14xf32>
    %341 = arith.mulf %340, %333 : vector<14x14xf32>
    %342 = arith.addf %332, %341 : vector<14x14xf32>
    %343 = vector.extract_strided_slice %272 {offsets = [2, 1], sizes = [14, 14], strides = [1, 1]} : vector<16x16xf32> to vector<14x14xf32>
    %344 = vector.broadcast %25 : f32 to vector<14x14xf32>
    %345 = arith.mulf %344, %343 : vector<14x14xf32>
    %346 = arith.addf %336, %345 : vector<14x14xf32>
    %347 = vector.broadcast %52 : f32 to vector<14x14xf32>
    %348 = arith.mulf %347, %343 : vector<14x14xf32>
    %349 = arith.addf %339, %348 : vector<14x14xf32>
    %350 = vector.broadcast %79 : f32 to vector<14x14xf32>
    %351 = arith.mulf %350, %343 : vector<14x14xf32>
    %352 = arith.addf %342, %351 : vector<14x14xf32>
    %353 = vector.extract_strided_slice %272 {offsets = [2, 2], sizes = [14, 14], strides = [1, 1]} : vector<16x16xf32> to vector<14x14xf32>
    %354 = vector.broadcast %26 : f32 to vector<14x14xf32>
    %355 = arith.mulf %354, %353 : vector<14x14xf32>
    %356 = arith.addf %346, %355 : vector<14x14xf32>
    %357 = vector.broadcast %53 : f32 to vector<14x14xf32>
    %358 = arith.mulf %357, %353 : vector<14x14xf32>
    %359 = arith.addf %349, %358 : vector<14x14xf32>
    %360 = vector.broadcast %80 : f32 to vector<14x14xf32>
    %361 = arith.mulf %360, %353 : vector<14x14xf32>
    %362 = arith.addf %352, %361 : vector<14x14xf32>
    %c0_15 = arith.constant 0 : index
    %c0_16 = arith.constant 0 : index
    %c0_17 = arith.constant 0 : index
    %c0_18 = arith.constant 0 : index
    %363 = vector.load %arg4[%c0_15, %c0_16, %c0_17, %c0_18] : memref<1x3x14x14xf32, #tpu.memory_space<vmem>>, vector<1x1x14x14xf32>
    %364 = vector.shape_cast %363 : vector<1x1x14x14xf32> to vector<14x14xf32>
    %365 = vector.shape_cast %356 : vector<14x14xf32> to vector<1x1x14x14xf32>
    tpu.vector_store %arg4[%c0_15, %c0_16, %c0_17, %c0_18], %365 {strides = array<i32>} : memref<1x3x14x14xf32, #tpu.memory_space<vmem>>, vector<1x1x14x14xf32>,
    %c0_19 = arith.constant 0 : index
    %c1_20 = arith.constant 1 : index
    %c0_21 = arith.constant 0 : index
    %c0_22 = arith.constant 0 : index
    %366 = vector.load %arg4[%c0_19, %c1_20, %c0_21, %c0_22] : memref<1x3x14x14xf32, #tpu.memory_space<vmem>>, vector<1x1x14x14xf32>
    %367 = vector.shape_cast %366 : vector<1x1x14x14xf32> to vector<14x14xf32>
    %368 = vector.shape_cast %359 : vector<14x14xf32> to vector<1x1x14x14xf32>
    tpu.vector_store %arg4[%c0_19, %c1_20, %c0_21, %c0_22], %368 {strides = array<i32>} : memref<1x3x14x14xf32, #tpu.memory_space<vmem>>, vector<1x1x14x14xf32>,
    %c0_23 = arith.constant 0 : index
    %c2_24 = arith.constant 2 : index
    %c0_25 = arith.constant 0 : index
    %c0_26 = arith.constant 0 : index
    %369 = vector.load %arg4[%c0_23, %c2_24, %c0_25, %c0_26] : memref<1x3x14x14xf32, #tpu.memory_space<vmem>>, vector<1x1x14x14xf32>
    %370 = vector.shape_cast %369 : vector<1x1x14x14xf32> to vector<14x14xf32>
    %371 = vector.shape_cast %362 : vector<14x14xf32> to vector<1x1x14x14xf32>
    tpu.vector_store %arg4[%c0_23, %c2_24, %c0_25, %c0_26], %371 {strides = array<i32>} : memref<1x3x14x14xf32, #tpu.memory_space<vmem>>, vector<1x1x14x14xf32>,
    return
  }
  func.func @transform_0(%arg0: i32) -> i32 {
    %c0_i32 = arith.constant 0 : i32
    %c0_i32_0 = arith.constant 0 : i32
    return %c0_i32 : i32
  }
  func.func @transform_1(%arg0: i32) -> i32 {
    %c0_i32 = arith.constant 0 : i32
    %c0_i32_0 = arith.constant 0 : i32
    return %c0_i32 : i32
  }
  func.func @transform_2(%arg0: i32) -> (i32, i32, i32, i32) {
    %c0_i32 = arith.constant 0 : i32
    %c0_i32_0 = arith.constant 0 : i32
    %c0_i32_1 = arith.constant 0 : i32
    %c0_i32_2 = arith.constant 0 : i32
    return %arg0, %c0_i32, %c0_i32_0, %c0_i32_1 : i32, i32, i32, i32
  }
  func.func @transform_3(%arg0: i32) -> (i32, i32, i32, i32) {
    %c0_i32 = arith.constant 0 : i32
    %c0_i32_0 = arith.constant 0 : i32
    %c0_i32_1 = arith.constant 0 : i32
    %c0_i32_2 = arith.constant 0 : i32
    return %arg0, %c0_i32, %c0_i32_0, %c0_i32_1 : i32, i32, i32, i32
  }
}

</mosaic_0001>

<bundles_post_ra>
// kernel: tpu_custom_call.1
= control target key start
LH: loop header
LB: loop body
LE: loop exit
PB: predicated region body
PF: predicated region fallthrough
CT: control target
= control target key end

     0   :  { %8 = vsyncpa [#allocation4], 0  ;;  %s2584_s0 = inlined_call_operand.hbm [shape: f32[81], index: 0, kind: input, shape index: {}]   ;;  %s2585_s1 = inlined_call_operand.vmem [shape: f32[3], index: 1, kind: input, shape index: {}]   ;;  %s2586_s2 = inlined_call_operand.hbm [shape: f32[2,3,16,16], index: 2, kind: input, shape index: {}]   ;;  %s2587_s3 = inlined_call_operand.vmem [shape: f32[2,3,14,14], index: 3, kind: output, shape index: {}]  }
   0x1   :  { %9 = vsyncpa [#allocation5], 0 }
   0x2   :  { %10 = vsyncpa [#allocation3], 0 }
   0x3   :  { %12 = vsyncpa [#allocation3 + $0x1], 0  ;;  %s1784_s12 = smov 0   ;;  %s1786_s13 = smov 0  }
   0x4   :  { %s1788_s14 = smov 0   ;;  %s1790_s15 = smov 0  }
   0x5 LB: > { %s1803_s16 = sadd.s32 4294967295, %s1755_s15   ;;  %s1806_s17 = sadd.s32 1, %s1755_s15   ;;  %s1755_s15 = sphi %s1790_s15, %s2602_s15   ;;  %s1751_s14 = sphi %s1788_s14, %s2601_s14   ;;  %s1747_s13 = sphi %s1786_s13, %s2600_s13   ;;  %s1743_s12 = sphi %s1784_s12, %s2599_s12  }
   0x6   : > { %s64_s18 = ssub.s32 %s1755_s15, %s1806_s17  ;;  %s67_s19 = sadd.s32 1, %s1751_s14 }
   0x7   : > { %p65_p0 = scmp.eq.s32.totalorder %s64_s18, 0  ;;  %p74_p1 = scmp.ne.s32.totalorder %s1751_s14, %s1747_s13 }
   0x8   : > { %p75_p2 = scmp.eq.s32.totalorder %s1755_s15, 0  ;;  %p80_p3 = scmp.ne.s32.totalorder %s1747_s13, %s1743_s12 }
   0x9   : > { %s1816_s20 = scalar_select %p65_p0, %s1751_s14, %s67_s19  }
   0xa   : > { %p76_p4 = por %p75_p2, %p74_p1  ;;  %p2588_p5 = scmp.eq.s32.totalorder %s1803_s16, 0 }
   0xb   : > { %p1486_p6 = scmp.ge.s32.totalorder %s1755_s15, 1  ;;  %p117_p7 = scmp.lt.s32.totalorder %s1755_s15, 3 }
   0xc   : > { %p1823_p8 = por %p2588_p5, %p80_p3  ;;  %p1614_p10 = scmp.lt.s32.totalorder %s1755_s15, 2 }
   0xd   : > { %p1827_p9 = pnand %p1486_p6, %p117_p7  ;;  %s139_s25 = sshll.u32 %s2585_s1, 4  ;;  %s140_s25 = int_to_ptr.vmem [resolvable:$true] %s139_s25 }
   0xe   : > { %s2590_s21 = scalar_select %p1823_p8, 1, 0 }
   0xf   : > { %p1601_p11 = pneg %p1827_p9  ;;  %p1837_p12 = pnand %p1614_p10, %p76_p4 }
  0x10   : > { %s150_s28 = sand.u32 1, %s1751_s14   ;;  %s1655_s4 = scalar_lea.hbm %s2584_s0, 16 }
  0x11   : > { %p1843_p13 = pnand %p1601_p11, %p2588_p5  ;;  %p1656_p0 = scmp.ne.s32.totalorder %s2584_s0, %s1655_s4 }
  0x12   : > { %p1662_p4 = scmp.lt.u32.totalorder %s1655_s4, %s2584_s0 }
  0x13   : > { %p1657_p1 = pneg %p1843_p13 }
  0x15   : > { %p1658_p2 = pnand %p1657_p1, %p1656_p0 }
  0x17   : > { %p1659_p3 = pneg %p1658_p2 }
  0x19   : > { %p1664_p6 = pnand %p1662_p4, %p1659_p3 }
  0x1b   : > { %1667 = shalt.err (!%p1664_p6)
}
  0x1c   : > { %s1757_s9 = smov [#allocation2]   ;;  %s1668_s12 = scalar_lea.vmem %s140_s25, 16 }
  0x1d   : > { %1604 = dma.hbm_to_smem (!%p1843_p13), %s2584_s0, 16, %s1757_s9, [#allocation4]  }
  0x1e   : > { %p1669_p7 = scmp.ne.s32.totalorder %s140_s25, %s1668_s12  ;;  %p1676_p5 = scmp.lt.s32.totalorder %s140_s25, %s140_s25 }
  0x1f   : > { %p1677_p0 = scmp.lt.s32.totalorder %s1668_s12, %s1668_s12 }
  0x20   : > { %p1671_p10 = pnand %p1669_p7, %p1657_p1 }
  0x21   : > { %p1678_p2 = por %p1677_p0, %p1676_p5 }
  0x22   : > { %p1672_p11 = pneg %p1671_p10 }
  0x24   : > { %p1679_p8 = pnand %p1678_p2, %p1672_p11 }
  0x26   : > { %1682 = shalt.err (!%p1679_p8)
}
  0x27   : > { %s1758_s18 = smov [#allocation6]   ;;  %s1587_s19 = smul.u32 48, %s150_s28 }
  0x28   : > { %1607 = dma.vmem_to_smem (!%p1843_p13), %s140_s25, 16, %s1758_s18, [#allocation5]  }
  0x29   : > { %s1588_s23 = smul.u32 768, %s1755_s15  ;;  %s154_s4 = scalar_lea.vmem [#allocation7], %s1587_s19 }
  0x2a   : > { %s161_s5 = sshll.u32 %s154_s4, 4  ;;  %s1874_s27 = scalar_lea.sflag [#allocation3], %s150_s28  ;;  %s1872_s5 = int_to_ptr.vmem [resolvable:$true] %s161_s5 }
  0x2b   : > { %s1870_s30 = scalar_lea.hbm %s2586_s2, %s1588_s23  ;;  %p1685_p8 = pneg %p1837_p12 }
  0x2c   : > { %s1683_s6 = scalar_lea.hbm %s1870_s30, 768  ;;  %s1688_s7 = scalar_lea.hbm %s2586_s2, 1536 }
  0x2d   : > { %p1684_p5 = scmp.ne.s32.totalorder %s1870_s30, %s1683_s6  ;;  %p1689_p3 = scmp.lt.u32.totalorder %s1870_s30, %s2586_s2 }
  0x2e   : > { %p1690_p4 = scmp.lt.u32.totalorder %s1688_s7, %s1683_s6  ;;  %p1692_p7 = scmp.lt.u32.totalorder %s1683_s6, %s1870_s30 }
  0x2f   : > { %p1686_p13 = pnand %p1685_p8, %p1684_p5 }
  0x30   : > { %p1691_p6 = por %p1690_p4, %p1689_p3 }
  0x31   : > { %p1687_p1 = pneg %p1686_p13 }
  0x32   : > { %p1693_p10 = por %p1692_p7, %p1691_p6 }
  0x34   : > { %p1694_p11 = pnand %p1693_p10, %p1687_p1 }
  0x36   : > { %1697 = shalt.err (!%p1694_p11)
}
  0x37   : > { %s1698_s28 = scalar_lea.vmem %s1872_s5, 768  ;;  %s1759_s10 = smov [#allocation7]  }
  0x38   : > { %p1699_p0 = scmp.ne.s32.totalorder %s1872_s5, %s1698_s28  ;;  %s1703_s11 = sshll.u32 %s1759_s10, 4  ;;  %s1704_s11 = int_to_ptr.vmem [resolvable:$false] %s1703_s11 }
  0x39   : > { %s1705_s12 = scalar_lea.vmem %s1704_s11, 1536  ;;  %p1706_p13 = scmp.lt.s32.totalorder %s1872_s5, %s1704_s11 }
  0x3a   : > { %p1701_p2 = pnand %p1699_p0, %p1685_p8  ;;  %p1707_p3 = scmp.lt.s32.totalorder %s1705_s12, %s1698_s28 }
  0x3c   : > { %p1702_p5 = pneg %p1701_p2  ;;  %p1708_p4 = por %p1707_p3, %p1706_p13 }
  0x3e   : > { %p1709_p6 = pnand %p1708_p4, %p1702_p5 }
  0x40   : > { %1712 = shalt.err (!%p1709_p6)
}
  0x41   : > { %s1760_s18 = smov 128   ;;  %s1761_s19 = smov 8  }
  0x42   : > { %1611 = dma.hbm_to_vmem [thread:$0]  (!%p1837_p12), %s1870_s30, 768, %s1872_s5, %s1874_s27, %s1760_s18, %s1760_s18, %s1761_s19  }
  0x43   : > { %173 = sbr.rel (%p1827_p9) target bundleno = 426 (0x1aa), region = 32  ;;  %p2594_p8 = scmp.eq.s32.totalorder (!%p1827_p9), %s1803_s16, 0 }
  0x4a   : > { %1730 = dma.done.wait (%p2594_p8), [#allocation4], 16   ;;  %p2595_p1 = pmov %p2594_p8 }
  0x4c   : > { %1732 = vsyncadd (%p2595_p1), [#allocation4], 4294967280  ;;  %p2596_p7 = pmov %p2595_p1 }
  0x4d   : > { %p2597_p10 = pmov %p2595_p1 }
  0x4e   : > { %1734 = dma.done.wait (%p2596_p7), [#allocation5], 16  }
  0x4f   : > { %1736 = vsyncadd (%p2597_p10), [#allocation5], 4294967280  ;;  %s183_s23 = sand.u32 1, %s1747_s13   ;;  %p2598_p9 = scmp.ne.s32.totalorder %s2590_s21, 0 }
  0x50   : > { %s1589_s26 = smul.u32 48, %s183_s23  ;;  %s184_s24 = scalar_lea.sflag [#allocation3], %s183_s23 }
  0x52   : > { %s1913_s29 = scalar_lea.vmem [#allocation7], %s1589_s26 }
  0x53   : > { %1738 = dma.done.wait (%p2598_p9), %s184_s24, 768  }
  0x54   : > { %1740 = vsyncadd (%p2598_p9), %s184_s24, 4294966528 }
  0x55   : > { %192 = sfence }
  0x56   : > { %s1522_s22 = sld [smem:[#allocation2 + $0x1c]]  ;;  %s1495_s30 = sld [smem:[#allocation2 + $0x1]]  ;;  %v1920_v0 = vld [vmem:[%s1913_s29] sm:$0xff]  ;;  %v1923_v1 = vld [vmem:[%s1913_s29 + $0x8] sm:$0xff]  ;;  %vm403_vm0 = vcmask 1046528   ;;  %vm536_vm1 = vcmask 1045504  }
  0x57   : > { %s1549_s4 = sld [smem:[#allocation2 + $0x37]]  ;;  %s1496_s5 = sld [smem:[#allocation2 + $0x2]]  ;;  %vm1386_vm2 = vcmask 111616   ;;  %vm1384_vm3 = vcmask 113664  }
  0x58   : > { %s1762_s21 = smov 127   ;;  %s1523_s27 = sld [smem:[#allocation2 + $0x1d]] }
  0x59   : > { %s1498_s6 = sld [smem:[#allocation2 + $0x4]]  ;;  %s1550_s15 = sld [smem:[#allocation2 + $0x38]] }
  0x5a   : > { %s1525_s25 = sld [smem:[#allocation2 + $0x1f]]  ;;  %s1552_s7 = sld [smem:[#allocation2 + $0x3a]] }
  0x5b   : > { %s1763_s8 = smov 126   ;;  %s1943_s9 = sld [smem:[#allocation2 + $0x5]] }
  0x5c   : > { %v333_v2 = vstv %s1522_s22  ;;  %v320_v4 = vstv %s1495_s30  ;;  %s1526_s28 = sld [smem:[#allocation2 + $0x20]]  ;;  %s1553_s10 = sld [smem:[#allocation2 + $0x3b]] }
  0x5d   : > { %v334_v3 = vmul.f32 %v333_v2, %v1920_v0  ;;  %v321_v5 = vmul.f32 %v320_v4, %v1920_v0  ;;  %v335_v6 = vmul.f32 %v333_v2, %v1923_v1  ;;  %v322_v7 = vmul.f32 %v320_v4, %v1923_v1  ;;  %s1501_s11 = sld [smem:[#allocation2 + $0x7]]  ;;  %s1528_s12 = sld [smem:[#allocation2 + $0x22]] }
  0x5e   : > { %v346_v8 = vstv %s1549_s4  ;;  %v359_v11 = vstv %s1496_s5  ;;  %v372_v14 = vstv %s1523_s27  ;;  %s1974_s18 = sld [smem:[#allocation2 + $0x3d]]  ;;  %s1977_s19 = sld [smem:[#allocation2 + $0x3]] }
  0x5f   : > { %338 = vrot.lane.b32.xlu1 %v334_v3, %s1762_s21  ;;  %325 = vrot.lane.b32.xlu0 %v321_v5, %s1762_s21  ;;  %v348_v9 = vmul.f32 %v346_v8, %v1923_v1  ;;  %v347_v10 = vmul.f32 %v346_v8, %v1920_v0  ;;  %v361_v12 = vmul.f32 %v359_v11, %v1923_v1  ;;  %v435_v15 = vstv %s1498_s6  ;;  %s1982_s23 = sld [smem:[#allocation2 + $0x8]]  ;;  %s1985_s26 = sld [smem:[#allocation2 + $0x1e]] }
  0x60   : > { %v360_v13 = vmul.f32 %v359_v11, %v1920_v0  ;;  %v374_v16 = vmul.f32 %v372_v14, %v1923_v1  ;;  %v373_v17 = vmul.f32 %v372_v14, %v1920_v0  ;;  %v385_v18 = vstv %s1550_s15  ;;  %s1993_s24 = sld [smem:[#allocation2 + $0x23]]  ;;  %s1995_s22 = sld [smem:[#allocation2 + $0x39]] }
  0x61   : > { %v436_v19 = vmul.f32 %v435_v15, %v1920_v0  ;;  %v437_v20 = vmul.f32 %v435_v15, %v1923_v1  ;;  %v451_v21 = vstv %s1525_s25  ;;  %v387_v22 = vmul.f32 %v385_v18, %v1923_v1  ;;  %s1998_s30 = sld [smem:[#allocation2 + $0x3e]]  ;;  %s2023_s5 = sld [smem:[#allocation2 + $0x21]] }
  0x62   : > { %v386_v23 = vmul.f32 %v385_v18, %v1920_v0  ;;  %v453_v24 = vmul.f32 %v451_v21, %v1923_v1  ;;  %v452_v27 = vmul.f32 %v451_v21, %v1920_v0  ;;  %v467_v28 = vstv %s1552_s7  ;;  %s2011_s4 = sld [smem:[#allocation2 + $0x6]]  ;;  %s2039_s27 = sld [smem:[#allocation2 + $0x3c]] }
  0x63   : > { %340 = vrot.lane.b32.xlu1 %v335_v6, %s1762_s21  ;;  %327 = vrot.lane.b32.xlu0 %v322_v7, %s1762_s21  ;;  %v441_v25 = vrot.slane %v437_v20, 1  ;;  %v440_v26 = vrot.slane %v436_v19, 1  ;;  %v483_v30 = vstv %s1943_s9  ;;  %v468_v33 = vmul.f32 %v467_v28, %v1920_v0  ;;  %s2063_s6 = sld [smem:[#allocation2 + $0xa]]  ;;  %s1531_s15 = sld [smem:[#allocation2 + $0x25]] }
  0x64   : > { %v457_v29 = vrot.slane %v453_v24, 1  ;;  %v456_v32 = vrot.slane %v452_v27, 1  ;;  %v469_v34 = vmul.f32 %v467_v28, %v1923_v1  ;;  %v484_v35 = vmul.f32 %v483_v30, %v1920_v0  ;;  %s1558_s25 = sld [smem:[#allocation2 + $0x40]]  ;;  %s1505_s7 = sld [smem:[#allocation2 + $0xb]] }
  0x65   : > { %v442_v31 = vsel %vm403_vm0, %v440_v26, %v441_v25  ;;  %v499_v36 = vstv %s1526_s28  ;;  %v472_v39 = vrot.slane %v468_v33, 1  ;;  %v485_v40 = vmul.f32 %v483_v30, %v1923_v1  ;;  %s1532_s9 = sld [smem:[#allocation2 + $0x26]]  ;;  %s1507_s28 = sld [smem:[#allocation2 + $0xd]] }
  0x66   : > { %v458_v37 = vsel %vm403_vm0, %v456_v32, %v457_v29  ;;  %v473_v38 = vrot.slane %v469_v34, 1  ;;  %v500_v41 = vmul.f32 %v499_v36, %v1920_v0  ;;  %v501_v42 = vmul.f32 %v499_v36, %v1923_v1  ;;  %p211_p12 = scmp.lt.s32.totalorder %s1803_s16, 1 }
  0x67   : > { %353 = vrot.lane.b32.xlu1 %v348_v9, %s1762_s21  ;;  %351 = vrot.lane.b32.xlu0 %v347_v10, %s1762_s21  ;;  %v489_v44 = vrot.slane %v485_v40, 1  ;;  %v488_v45 = vrot.slane %v484_v35, 1  ;;  %v515_v46 = vstv %s1553_s10  ;;  %v568_v52 = vstv %s1501_s11  ;;  %s1559_s10 = sld [smem:[#allocation2 + $0x41]]  ;;  %s1534_s11 = sld [smem:[#allocation2 + $0x28]] }
  0x68   : > { %v474_v43 = vsel %vm403_vm0, %v472_v39, %v473_v38  ;;  %v505_v47 = vrot.slane %v501_v42, 1  ;;  %v504_v48 = vrot.slane %v500_v41, 1  ;;  %v516_v50 = vmul.f32 %v515_v46, %v1920_v0  ;;  %s2604_s16 = smov (!%p211_p12, %s1803_s16), 1 }
  0x69   : > { %v490_v49 = vsel %vm403_vm0, %v488_v45, %v489_v44  ;;  %v517_v51 = vmul.f32 %v515_v46, %v1923_v1  ;;  %v569_v54 = vmul.f32 %v568_v52, %v1920_v0  ;;  %v570_v57 = vmul.f32 %v568_v52, %v1923_v1 }
  0x6a   : > { %v506_v53 = vsel %vm403_vm0, %v504_v48, %v505_v47  ;;  %v520_v56 = vrot.slane %v516_v50, 1  ;;  %v584_v58 = vstv %s1528_s12  ;;  %v600_v2 = vstv %s1974_s18  ;;  %s1561_s12 = sld [smem:[#allocation2 + $0x43]]  ;;  %s1508_s18 = sld [smem:[#allocation2 + $0xe]] }
  0x6b   : > { %366 = vrot.lane.b32.xlu1 %v361_v12, %s1763_s8  ;;  %364 = vrot.lane.b32.xlu0 %v360_v13, %s1763_s8  ;;  %v521_v55 = vrot.slane %v517_v51, 1  ;;  %v585_v59 = vmul.f32 %v584_v58, %v1920_v0  ;;  %v586_v60 = vmul.f32 %v584_v58, %v1923_v1  ;;  %v574_v62 = vrot.slane %v570_v57, 2 }
  0x6c   : > { %v573_v63 = vrot.slane %v569_v54, 2  ;;  %v398_v3 = vstv %s1977_s19  ;;  %v601_v6 = vmul.f32 %v600_v2, %v1920_v0  ;;  %v616_v7 = vstv %s1982_s23  ;;  %s1535_s19 = sld [smem:[#allocation2 + $0x29]]  ;;  %s1562_s23 = sld [smem:[#allocation2 + $0x44]] }
  0x6d   : > { %v522_v61 = vsel %vm403_vm0, %v520_v56, %v521_v55  ;;  %v590_v4 = vrot.slane %v586_v60, 2  ;;  %v589_v5 = vrot.slane %v585_v59, 2  ;;  %v602_v9 = vmul.f32 %v600_v2, %v1923_v1  ;;  %v2097_v2 = vld [vmem:[%s1913_s29 + $0x18] sm:$0xff] }
  0x6e   : > { %v575_v8 = vsel %vm536_vm1, %v573_v63, %v574_v62  ;;  %v2007_v10 = vmul.f32 %v398_v3, %v1923_v1  ;;  %v399_v11 = vmul.f32 %v398_v3, %v1920_v0  ;;  %v411_v12 = vstv %s1985_s26  ;;  %s1510_s26 = sld [smem:[#allocation2 + $0x10]] }
  0x6f   : > { %379 = vrot.lane.b32.xlu1 %v374_v16, %s1763_s8  ;;  %377 = vrot.lane.b32.xlu0 %v373_v17, %s1763_s8  ;;  %v617_v13 = vmul.f32 %v616_v7, %v1920_v0  ;;  %v591_v16 = vsel %vm536_vm1, %v589_v5, %v590_v4  ;;  %v618_v17 = vmul.f32 %v616_v7, %v1923_v1  ;;  %v606_v20 = vrot.slane %v602_v9, 2  ;;  %v2102_v5 = vld [vmem:[%s1913_s29 + $0x10] sm:$0xff] }
  0x70   : > { %v405_v14 = vrot.slane %v2007_v10, 1  ;;  %v404_v15 = vrot.slane %v399_v11, 1  ;;  %v2020_v18 = vmul.f32 %v411_v12, %v1923_v1  ;;  %v412_v19 = vmul.f32 %v411_v12, %v1920_v0 }
  0x71   : > { %v605_v21 = vrot.slane %v601_v6, 2  ;;  %v423_v26 = vstv %s1995_s22  ;;  %v648_v27 = vstv %s1998_s30  ;;  %v622_v30 = vrot.slane %v618_v17, 2  ;;  %s2156_s22 = sld [smem:[#allocation2]]  ;;  %s2161_s30 = sld [smem:[#allocation2 + $0x46]] }
  0x72   : > { %v417_v24 = vrot.slane %v2020_v18, 1  ;;  %v2036_v28 = vmul.f32 %v423_v26, %v1923_v1  ;;  %v649_v39 = vmul.f32 %v648_v27, %v1920_v0  ;;  %v544_v45 = vstv %s2023_s5  ;;  %s2167_s5 = sld [smem:[#allocation6]] }
  0x73   : > { %392 = vrot.lane.b32.xlu1 %v387_v22, %s1763_s8  ;;  %390 = vrot.lane.b32.xlu0 %v386_v23, %s1763_s8  ;;  %v632_v22 = vstv %s1993_s24  ;;  %v2029_v23 = vsel %vm403_vm0, %v404_v15, %v405_v14  ;;  %v607_v34 = vsel %vm536_vm1, %v605_v21, %v606_v20  ;;  %v2072_v51 = vmul.f32 %v544_v45, %v1923_v1  ;;  %s2152_s24 = sld [smem:[#allocation2 + $0x2b]] }
  0x74   : > { %v633_v32 = vmul.f32 %v632_v22, %v1920_v0  ;;  %v634_v35 = vmul.f32 %v632_v22, %v1923_v1  ;;  %v429_v36 = vrot.slane %v2036_v28, 1  ;;  %v653_v58 = vrot.slane %v649_v39, 2 }
  0x75   : > { %v550_v56 = vrot.slane %v2072_v51, 2  ;;  %v682_v3 = vstv %s2063_s6  ;;  %v695_v9 = vstv %s1531_s15  ;;  %v721_v17 = vstv %s1505_s7  ;;  %s2176_s6 = sld [smem:[#allocation6 + $0x1]]  ;;  %s2180_s15 = sld [smem:[#allocation2 + $0x36]] }
  0x76   : > { %v638_v46 = vrot.slane %v634_v35, 2  ;;  %v684_v7 = vmul.f32 %v2097_v2, %v682_v3  ;;  %v697_v11 = vmul.f32 %v2097_v2, %v695_v9  ;;  %v696_v12 = vmul.f32 %v2102_v5, %v695_v9  ;;  %s2192_s7 = sld [smem:[#allocation6 + $0x2]] }
  0x77   : > { %445 = vrot.lane.b32.xlu1 %v441_v25, %s1762_s21  ;;  %443 = vrot.lane.b32.xlu0 %v442_v31, %s1762_s21  ;;  %v416_v25 = vrot.slane %v412_v19, 1  ;;  %v621_v31 = vrot.slane %v617_v13, 2  ;;  %v708_v13 = vstv %s1558_s25  ;;  %v723_v19 = vmul.f32 %v2097_v2, %v721_v17  ;;  %s2188_s25 = sld [smem:[#allocation2 + $0x2c]] }
  0x78   : > { %v710_v15 = vmul.f32 %v2097_v2, %v708_v13  ;;  %v734_v21 = vstv %s1532_s9  ;;  %v796_v22 = vstv %s1507_s28  ;;  %v828_v35 = vstv %s1561_s12  ;;  %s2203_s9 = sld [smem:[#allocation2 + $0x47]]  ;;  %s2229_s28 = sld [smem:[#allocation2 + $0x13]] }
  0x79   : > { %v2046_v33 = vsel %vm403_vm0, %v416_v25, %v417_v24  ;;  %v623_v42 = vsel %vm536_vm1, %v621_v31, %v622_v30  ;;  %v736_v25 = vmul.f32 %v2097_v2, %v734_v21  ;;  %v812_v31 = vstv %s1534_s11  ;;  %s2251_s11 = sld [smem:[#allocation2 + $0x49]]  ;;  %s2272_s12 = sld [smem:[#allocation2 + $0x2f]] }
  0x7a   : > { %v813_v39 = vmul.f32 %v2102_v5, %v812_v31 }
  0x7b   : > { %461 = vrot.lane.b32.xlu1 %v457_v29, %s1762_s21  ;;  %459 = vrot.lane.b32.xlu0 %v458_v37, %s1762_s21  ;;  %v424_v29 = vmul.f32 %v423_v26, %v1920_v0  ;;  %v735_v26 = vmul.f32 %v2102_v5, %v734_v21 }
  0x7d   : > { %v428_v37 = vrot.slane %v424_v29, 1  ;;  %v797_v29 = vmul.f32 %v2102_v5, %v796_v22 }
  0x7f   : > { %477 = vrot.lane.b32.xlu1 %v473_v38, %s1762_s21  ;;  %475 = vrot.lane.b32.xlu0 %v474_v43, %s1762_s21  ;;  %v531_v38 = vstv %s2011_s4  ;;  %v2057_v40 = vsel %vm403_vm0, %v428_v37, %v429_v36  ;;  %v650_v43 = vmul.f32 %v648_v27, %v1923_v1  ;;  %v747_v27 = vstv %s1559_s10  ;;  %s2164_s4 = sld [smem:[#allocation2 + $0x1b]]  ;;  %s2236_s10 = sld [smem:[#allocation2 + $0x2e]] }
  0x80   : > { %v532_v41 = vmul.f32 %v531_v38, %v1920_v0  ;;  %v1068_v18 = vstv %s2251_s11  ;;  %s2394_s11 = sld [smem:[#allocation2 + $0x27]] }
  0x81   : > { %v654_v54 = vrot.slane %v650_v43, 2 }
  0x82   : > { %v537_v48 = vrot.slane %v532_v41, 2  ;;  %v814_v41 = vmul.f32 %v2097_v2, %v812_v31 }
  0x83   : > { %493 = vrot.lane.b32.xlu1 %v489_v44, %s1763_s8  ;;  %491 = vrot.lane.b32.xlu0 %v490_v49, %s1763_s8  ;;  %v2066_v44 = vmul.f32 %v531_v38, %v1923_v1  ;;  %v545_v49 = vmul.f32 %v544_v45, %v1920_v0  ;;  %v801_v38 = vrot.slane %v797_v29, 1 }
  0x84   : > { %v818_v45 = vrot.slane %v814_v41, 1 }
  0x85   : > { %v538_v50 = vrot.slane %v2066_v44, 2  ;;  %v549_v52 = vrot.slane %v545_v49, 2 }
  0x87   : > { %509 = vrot.lane.b32.xlu1 %v505_v47, %s1763_s8  ;;  %507 = vrot.lane.b32.xlu0 %v506_v53, %s1763_s8  ;;  %v637_v47 = vrot.slane %v633_v32, 2  ;;  %v556_v53 = vstv %s2039_s27  ;;  %v749_v32 = vmul.f32 %v2097_v2, %v747_v27  ;;  %s2172_s27 = sld [smem:[#allocation2 + $0x11]] }
  0x88   : > { %v557_v59 = vmul.f32 %v556_v53, %v1920_v0  ;;  %v2086_v60 = vmul.f32 %v556_v53, %v1923_v1 }
  0x89   : > { %v639_v57 = vsel %vm536_vm1, %v637_v47, %v638_v46  ;;  %v829_v47 = vmul.f32 %v2102_v5, %v828_v35 }
  0x8a   : > { %v562_v63 = vrot.slane %v2086_v60, 2 }
  0x8b   : > { %525 = vrot.lane.b32.xlu1 %v521_v55, %s1763_s8  ;;  %523 = vrot.lane.b32.xlu0 %v522_v61, %s1763_s8  ;;  %v2080_v55 = vsel %vm536_vm1, %v537_v48, %v538_v50  ;;  %v2091_v61 = vsel %vm536_vm1, %v549_v52, %v550_v56  ;;  %v844_v48 = vstv %s1508_s18  ;;  %v860_v52 = vstv %s1535_s19  ;;  %s2274_s18 = sld [smem:[#allocation2 + $0x16]]  ;;  %s2281_s19 = sld [smem:[#allocation2 + $0x4a]] }
  0x8f   : > { %578 = vrot.lane.b32.xlu1 %v574_v62, %s1762_s21  ;;  %576 = vrot.lane.b32.xlu0 %v575_v8, %s1762_s21  ;;  %v561_v62 = vrot.slane %v557_v59, 2  ;;  %v683_v8 = vmul.f32 %v2102_v5, %v682_v3  ;;  %v861_v59 = vmul.f32 %v2102_v5, %v860_v52 }
  0x91   : > { %v2107_v6 = vsel %vm536_vm1, %v561_v62, %v562_v63  ;;  %v862_v62 = vmul.f32 %v2097_v2, %v860_v52  ;;  %v1107_v44 = vstv %s2281_s19  ;;  %s1515_s19 = sld [smem:[#allocation2 + $0x15]] }
  0x93   : > { %594 = vrot.lane.b32.xlu1 %v590_v4, %s1762_s21  ;;  %592 = vrot.lane.b32.xlu0 %v591_v16, %s1762_s21  ;;  %v655_v4 = vsel %vm536_vm1, %v653_v58, %v654_v54  ;;  %v709_v16 = vmul.f32 %v2102_v5, %v708_v13  ;;  %v846_v58 = vmul.f32 %v2097_v2, %v844_v48  ;;  %v866_v9 = vrot.slane %v862_v62, 1 }
  0x97   : > { %610 = vrot.lane.b32.xlu1 %v606_v20, %s1762_s21  ;;  %608 = vrot.lane.b32.xlu0 %v607_v34, %s1762_s21  ;;  %v722_v20 = vmul.f32 %v2102_v5, %v721_v17  ;;  %v748_v34 = vmul.f32 %v2102_v5, %v747_v27 }
  0x9b   : > { %626 = vrot.lane.b32.xlu1 %v622_v30, %s1763_s8  ;;  %624 = vrot.lane.b32.xlu0 %v623_v42, %s1763_s8  ;;  %v798_v30 = vmul.f32 %v2097_v2, %v796_v22  ;;  %v830_v42 = vmul.f32 %v2097_v2, %v828_v35  ;;  %v960_v35 = vstv %s2161_s30  ;;  %s2326_s30 = sld [smem:[#allocation2 + $0x4d]] }
  0x9d   : > { %v802_v37 = vrot.slane %v798_v30, 1  ;;  %v834_v49 = vrot.slane %v830_v42, 1 }
  0x9f   : > { %642 = vrot.lane.b32.xlu1 %v638_v46, %s1763_s8  ;;  %640 = vrot.lane.b32.xlu0 %v639_v57, %s1763_s8  ;;  %v803_v43 = vsel %vm403_vm0, %v801_v38, %v802_v37  ;;  %v817_v46 = vrot.slane %v813_v39, 1  ;;  %v845_v57 = vmul.f32 %v2102_v5, %v844_v48  ;;  %v310_v38 = vstv %s2164_s4  ;;  %s2331_s4 = sld [smem:[#allocation2 + $0x9]] }
  0xa0   : > { %v300_v39 = vstv %s2167_s5  ;;  %v962_v48 = vmul.f32 %v2097_v2, %v960_v35  ;;  %s2337_s5 = sld [smem:[#allocation2 + $0x19]] }
  0xa1   : > { %v819_v53 = vsel %vm403_vm0, %v817_v46, %v818_v45 }
  0xa3   : > { %658 = vrot.lane.b32.xlu1 %v654_v54, %s1763_s8  ;;  %656 = vrot.lane.b32.xlu0 %v655_v4, %s1763_s8  ;;  %v833_v54 = vrot.slane %v829_v47, 1  ;;  %v850_v4 = vrot.slane %v846_v58, 1  ;;  %v315_v58 = vstv %s2180_s15  ;;  %s2350_s15 = sld [smem:[#allocation2 + $0x3f]] }
  0xa5   : > { %v835_v3 = vsel %vm403_vm0, %v833_v54, %v834_v49  ;;  %v311_v54 = vmul.f32 %v310_v38, %v1920_v0 }
  0xa7   : > { %689 = vrot.lane.b32.xlu1 %v684_v7, %s1762_s21  ;;  %687 = vrot.lane.b32.xlu0 %v683_v8, %s1762_s21  ;;  %v849_v7 = vrot.slane %v845_v57, 1  ;;  %v876_v8 = vstv %s1562_s23  ;;  %s2283_s23 = sld [smem:[#allocation2 + $0x31]] }
  0xa8   : > { %v877_v13 = vmul.f32 %v2102_v5, %v876_v8 }
  0xaa   : > { %v881_v22 = vrot.slane %v877_v13, 1 }
  0xab   : > { %702 = vrot.lane.b32.xlu1 %v697_v11, %s1762_s21  ;;  %700 = vrot.lane.b32.xlu0 %v696_v12, %s1762_s21  ;;  %v865_v11 = vrot.slane %v861_v59, 1  ;;  %v851_v12 = vsel %vm403_vm0, %v849_v7, %v850_v4  ;;  %v966_v7 = vrot.slane %v962_v48, 2 }
  0xaf   : > { %715 = vrot.lane.b32.xlu1 %v710_v15, %s1762_s21  ;;  %713 = vrot.lane.b32.xlu0 %v709_v16, %s1762_s21  ;;  %v878_v15 = vmul.f32 %v2097_v2, %v876_v8  ;;  %v928_v16 = vstv %s1510_s26  ;;  %s2292_s26 = sld [smem:[#allocation2 + $0x4c]] }
  0xb0   : > { %v929_v17 = vmul.f32 %v2102_v5, %v928_v16 }
  0xb1   : > { %v882_v21 = vrot.slane %v878_v15, 1  ;;  %v302_v15 = vstv %s2192_s7  ;;  %s2365_s7 = sld [smem:[#allocation2 + $0x1a]] }
  0xb2   : > { %v933_v29 = vrot.slane %v929_v17, 2  ;;  %v316_v17 = vmul.f32 %v315_v58, %v1920_v0 }
  0xb3   : > { %728 = vrot.lane.b32.xlu1 %v723_v19, %s1763_s8  ;;  %726 = vrot.lane.b32.xlu0 %v722_v20, %s1763_s8  ;;  %v930_v19 = vmul.f32 %v2097_v2, %v928_v16  ;;  %v867_v20 = vsel %vm403_vm0, %v865_v11, %v866_v9  ;;  %v883_v31 = vsel %vm403_vm0, %v881_v22, %v882_v21 }
  0xb4   : > { %v317_v16 = vmul.f32 %v315_v58, %v1923_v1 }
  0xb5   : > { %v934_v27 = vrot.slane %v930_v19, 2 }
  0xb7   : > { %741 = vrot.lane.b32.xlu1 %v736_v25, %s1763_s8  ;;  %739 = vrot.lane.b32.xlu0 %v735_v26, %s1763_s8  ;;  %v944_v25 = vstv %s2152_s24  ;;  %v305_v26 = vstv %s2156_s22  ;;  %v935_v42 = vsel %vm536_vm1, %v933_v29, %v934_v27  ;;  %s2307_s24 = sld [smem:[#allocation2 + $0x17]]  ;;  %s2319_s22 = sld [smem:[#allocation2 + $0x32]] }
  0xb8   : > { %v306_v41 = vmul.f32 %v305_v26, %v1920_v0  ;;  %v307_v11 = vmul.f32 %v305_v26, %v1923_v1  ;;  %v1008_v29 = vstv %s2203_s9  ;;  %v318_v0 = vadd.f32 %v316_v17, %v302_v15  ;;  %v2255_v17 = vld [vmem:[%s1913_s29 + $0x20] sm:$0xff]  ;;  %s2380_s9 = sld [smem:[#allocation2 + $0x35]] }
  0xb9   : > { %v1108_v51 = vmul.f32 %v2255_v17, %v1107_v44 }
  0xba   : > { %v308_v57 = vadd.f32 %v306_v41, %v300_v39 }
  0xbb   : > { %754 = vrot.lane.b32.xlu1 %v749_v32, %s1763_s8  ;;  %752 = vrot.lane.b32.xlu0 %v748_v34, %s1763_s8  ;;  %v945_v32 = vmul.f32 %v2102_v5, %v944_v25  ;;  %v946_v34 = vmul.f32 %v2097_v2, %v944_v25 }
  0xbd   : > { %v950_v46 = vrot.slane %v946_v34, 2  ;;  %v949_v47 = vrot.slane %v945_v32, 2  ;;  %v309_v32 = vadd.f32 %v307_v11, %v300_v39  ;;  %v1010_v39 = vmul.f32 %v2097_v2, %v1008_v29 }
  0xbf   : > { %806 = vrot.lane.b32.xlu1 %v802_v37, %s1762_s21  ;;  %804 = vrot.lane.b32.xlu0 %v803_v43, %s1762_s21  ;;  %v961_v43 = vmul.f32 %v2102_v5, %v960_v35  ;;  %v319_v35 = vadd.f32 %v317_v16, %v302_v15  ;;  %v1042_v15 = vstv %s2229_s28  ;;  %s2385_s28 = sld [smem:[#allocation2 + $0xc]] }
  0xc1   : > { %v965_v8 = vrot.slane %v961_v43, 2  ;;  %v1009_v43 = vmul.f32 %v2102_v5, %v1008_v29 }
  0xc3   : > { %822 = vrot.lane.b32.xlu1 %v818_v45, %s1762_s21  ;;  %820 = vrot.lane.b32.xlu0 %v819_v53, %s1762_s21  ;;  %v301_v53 = vstv %s2176_s6  ;;  %s2347_s6 = sld [smem:[#allocation2 + $0x34]] }
  0xc4   : > { %v313_v13 = vadd.f32 %v311_v54, %v301_v53 }
  0xc7   : > { %838 = vrot.lane.b32.xlu1 %v834_v49, %s1762_s21  ;;  %836 = vrot.lane.b32.xlu0 %v835_v3, %s1762_s21  ;;  %v976_v49 = vstv %s2172_s27  ;;  %s2343_s27 = sld [smem:[#allocation2 + $0x24]] }
  0xc8   : > { %v977_v59 = vmul.f32 %v2102_v5, %v976_v49  ;;  %v978_v62 = vmul.f32 %v2097_v2, %v976_v49 }
  0xca   : > { %v982_v19 = vrot.slane %v978_v62, 2  ;;  %v1013_v62 = vrot.slane %v1009_v43, 2 }
  0xcb   : > { %854 = vrot.lane.b32.xlu1 %v850_v4, %s1763_s8  ;;  %852 = vrot.lane.b32.xlu0 %v851_v12, %s1763_s8  ;;  %v951_v4 = vsel %vm536_vm1, %v949_v47, %v950_v46 }
  0xcf   : > { %870 = vrot.lane.b32.xlu1 %v866_v9, %s1763_s8  ;;  %868 = vrot.lane.b32.xlu0 %v867_v20, %s1763_s8  ;;  %v992_v9 = vstv %s2188_s25  ;;  %v981_v20 = vrot.slane %v977_v59, 2  ;;  %s2356_s25 = sld [smem:[#allocation2 + $0x4f]] }
  0xd0   : > { %v994_v26 = vmul.f32 %v2097_v2, %v992_v9 }
  0xd1   : > { %v2182_v30 = vpop.permute.xlu1 %338  ;;  %v326_v37 = vpop.permute.xlu0 %325 }
  0xd2   : > { %v331_v22 = vadd.f32 %v326_v37, %v308_v57 }
  0xd3   : > { %886 = vrot.lane.b32.xlu1 %v882_v21, %s1763_s8  ;;  %884 = vrot.lane.b32.xlu0 %v883_v31, %s1763_s8  ;;  %v993_v21 = vmul.f32 %v2102_v5, %v992_v9  ;;  %v312_v31 = vmul.f32 %v310_v38, %v1923_v1  ;;  %v998_v1 = vrot.slane %v994_v26, 2 }
  0xd5   : > { %v2199_v45 = vpop.permute.xlu1 %340  ;;  %v328_v52 = vpop.permute.xlu0 %327  ;;  %v997_v37 = vrot.slane %v993_v21, 2  ;;  %v314_v48 = vadd.f32 %v312_v31, %v301_v53 }
  0xd6   : > { %v332_v49 = vadd.f32 %v328_v52, %v309_v32 }
  0xd7   : > { %938 = vrot.lane.b32.xlu1 %v934_v27, %s1762_s21  ;;  %936 = vrot.lane.b32.xlu0 %v935_v42, %s1762_s21  ;;  %v967_v27 = vsel %vm536_vm1, %v965_v8, %v966_v7  ;;  %v983_v42 = vsel %vm536_vm1, %v981_v20, %v982_v19  ;;  %v345_v53 = vadd.f32 %v2199_v45, %v314_v48 }
  0xd9   : > { %v354_v3 = vpop.permute.xlu1 %353  ;;  %v352_v12 = vpop.permute.xlu0 %351 }
  0xda   : > { %v358_v58 = vadd.f32 %v354_v3, %v319_v35 }
  0xdb   : > { %954 = vrot.lane.b32.xlu1 %v950_v46, %s1762_s21  ;;  %952 = vrot.lane.b32.xlu0 %v951_v4, %s1762_s21  ;;  %v344_v46 = vadd.f32 %v2182_v30, %v313_v13  ;;  %v357_v30 = vadd.f32 %v352_v12, %v318_v0  ;;  %v2246_v13 = vld [vmem:[%s1913_s29 + $0x28] sm:$0xff]  ;;  %s2265_s29 = sld [smem:[#allocation2 + $0x14]]  ;;  %v1069_v0 = vmul.f32 %v2255_v17, %v1068_v18 }
  0xdd   : > { %v367_v25 = vpop.permute.xlu1 %366  ;;  %v365_v34 = vpop.permute.xlu0 %364 }
  0xde   : > { %v370_v41 = vadd.f32 %v365_v34, %v331_v22  ;;  %v371_v59 = vadd.f32 %v367_v25, %v332_v49  ;;  %v1055_v22 = vstv %s2236_s10  ;;  %s2392_s10 = sld [smem:[#allocation2 + $0x50]] }
  0xdf   : > { %970 = vrot.lane.b32.xlu1 %v966_v7, %s1762_s21  ;;  %968 = vrot.lane.b32.xlu0 %v967_v27, %s1762_s21  ;;  %v1014_v7 = vrot.slane %v1010_v39, 2  ;;  %v1057_v29 = vmul.f32 %v2246_v13, %v1055_v22  ;;  %v1056_v31 = vmul.f32 %v2255_v17, %v1055_v22  ;;  %v1094_v39 = vstv %s2272_s12  ;;  %s1536_s12 = sld [smem:[#allocation2 + $0x2a]] }
  0xe0   : > { %v409_v38 = vadd.f32 %v2029_v23, %v370_v41  ;;  %v999_v23 = vsel %vm536_vm1, %v997_v37, %v998_v1  ;;  %v410_v12 = vadd.f32 %v405_v14, %v371_v59  ;;  %v1044_v14 = vmul.f32 %v2246_v13, %v1042_v15 }
  0xe1   : > { %v380_v47 = vpop.permute.xlu1 %379  ;;  %v378_v54 = vpop.permute.xlu0 %377  ;;  %v1015_v16 = vsel %vm536_vm1, %v1013_v62, %v1014_v7  ;;  %v1070_v41 = vmul.f32 %v2246_v13, %v1068_v18 }
  0xe2   : > { %v383_v57 = vadd.f32 %v378_v54, %v344_v46  ;;  %v384_v11 = vadd.f32 %v380_v47, %v345_v53 }
  0xe3   : > { %986 = vrot.lane.b32.xlu1 %v982_v19, %s1763_s8  ;;  %984 = vrot.lane.b32.xlu0 %v983_v42, %s1763_s8  ;;  %v1081_v42 = vstv %s2265_s29  ;;  %s2404_s29 = sld [smem:[#allocation2 + $0x42]] }
  0xe4   : > { %v421_v52 = vadd.f32 %v2046_v33, %v383_v57  ;;  %v422_v28 = vadd.f32 %v417_v24, %v384_v11  ;;  %v1156_v57 = vstv %s2274_s18  ;;  %v1109_v11 = vmul.f32 %v2246_v13, %v1107_v44  ;;  %s1563_s18 = sld [smem:[#allocation2 + $0x45]] }
  0xe5   : > { %v393_v4 = vpop.permute.xlu1 %392  ;;  %v391_v3 = vpop.permute.xlu0 %390  ;;  %v1288_v44 = vstv %s2337_s5  ;;  %s2512_s5 = sld [smem:[#allocation2 + $0x4e]] }
  0xe6   : > { %v397_v8 = vadd.f32 %v393_v4, %v358_v58  ;;  %v396_v9 = vadd.f32 %v391_v3, %v357_v30  ;;  %v1096_v30 = vmul.f32 %v2246_v13, %v1094_v39  ;;  %v1095_v4 = vmul.f32 %v2255_v17, %v1094_v39 }
  0xe7   : > { %1002 = vrot.lane.b32.xlu1 %v998_v1, %s1763_s8  ;;  %1000 = vrot.lane.b32.xlu0 %v999_v23, %s1763_s8  ;;  %v1083_v1 = vmul.f32 %v2246_v13, %v1081_v42  ;;  %v1172_v3 = vstv %s2283_s23  ;;  %s1542_s23 = sld [smem:[#allocation2 + $0x30]] }
  0xe8   : > { %v434_v33 = vadd.f32 %v429_v36, %v397_v8  ;;  %v433_v19 = vadd.f32 %v2057_v40, %v396_v9  ;;  %v1043_v36 = vmul.f32 %v2255_v17, %v1042_v15 }
  0xe9   : > { %v446_v45 = vpop.permute.xlu1 %445  ;;  %v444_v21 = vpop.permute.xlu0 %443 }
  0xea   : > { %v450_v20 = vadd.f32 %v446_v45, %v410_v12  ;;  %v449_v10 = vadd.f32 %v444_v21, %v409_v38  ;;  %v1082_v38 = vmul.f32 %v2255_v17, %v1081_v42  ;;  %v1188_v12 = vstv %s2292_s26  ;;  %s1539_s26 = sld [smem:[#allocation2 + $0x2d]] }
  0xeb   : > { %1018 = vrot.lane.b32.xlu1 %v1014_v7, %s1763_s8  ;;  %1016 = vrot.lane.b32.xlu0 %v1015_v16, %s1763_s8  ;;  %v1173_v16 = vmul.f32 %v2255_v17, %v1172_v3  ;;  %v1189_v60 = vmul.f32 %v2255_v17, %v1188_v12 }
  0xed   : > { %v462_v25 = vpop.permute.xlu1 %461  ;;  %v460_v27 = vpop.permute.xlu0 %459 }
  0xee   : > { %v466_v40 = vadd.f32 %v462_v25, %v422_v28  ;;  %v465_v26 = vadd.f32 %v460_v27, %v421_v52  ;;  %v1157_v52 = vmul.f32 %v2255_v17, %v1156_v57 }
  0xef   : > { %1049 = vrot.lane.b32.xlu1 %v1044_v14, %s1762_s21  ;;  %1047 = vrot.lane.b32.xlu0 %v1043_v36, %s1762_s21  ;;  %v1177_v36 = vrot.slane %v1173_v16, 1 }
  0xf1   : > { %v478_v24 = vpop.permute.xlu1 %477  ;;  %v476_v34 = vpop.permute.xlu0 %475 }
  0xf2   : > { %v482_v32 = vadd.f32 %v478_v24, %v434_v33  ;;  %v481_v35 = vadd.f32 %v476_v34, %v433_v19  ;;  %v1161_v33 = vrot.slane %v1157_v52, 1  ;;  %v1174_v19 = vmul.f32 %v2246_v13, %v1172_v3 }
  0xf3   : > { %1062 = vrot.lane.b32.xlu1 %v1057_v29, %s1762_s21  ;;  %1060 = vrot.lane.b32.xlu0 %v1056_v31, %s1762_s21  ;;  %v1193_v29 = vrot.slane %v1189_v60, 1  ;;  %v1220_v34 = vstv %s2319_s22  ;;  %v1290_v3 = vmul.f32 %v2246_v13, %v1288_v44  ;;  %v1320_v60 = vstv %s2356_s25  ;;  %s2480_s22 = sld [smem:[#allocation2 + $0x4b]] }
  0xf4   : > { %v1178_v28 = vrot.slane %v1174_v19, 1  ;;  %v677_v19 = vstv %s2350_s15 }
  0xf5   : > { %v494_v37 = vpop.permute.xlu1 %493  ;;  %v492_v46 = vpop.permute.xlu0 %491 }
  0xf6   : > { %v498_v43 = vadd.f32 %v494_v37, %v450_v20  ;;  %v497_v47 = vadd.f32 %v492_v46, %v449_v10  ;;  %v1179_v18 = vsel %vm403_vm0, %v1177_v36, %v1178_v28  ;;  %v1221_v37 = vmul.f32 %v2255_v17, %v1220_v34 }
  0xf7   : > { %1075 = vrot.lane.b32.xlu1 %v1070_v41, %s1762_s21  ;;  %1073 = vrot.lane.b32.xlu0 %v1069_v0, %s1762_s21 }
  0xf8   : > { %v543_v48 = vadd.f32 %v538_v50, %v498_v43  ;;  %v542_v54 = vadd.f32 %v2080_v55, %v497_v47  ;;  %v1158_v55 = vmul.f32 %v2246_v13, %v1156_v57 }
  0xf9   : > { %v510_v49 = vpop.permute.xlu1 %509  ;;  %v508_v59 = vpop.permute.xlu0 %507 }
  0xfa   : > { %v514_v58 = vadd.f32 %v510_v49, %v466_v40  ;;  %v513_v62 = vadd.f32 %v508_v59, %v465_v26  ;;  %v1204_v40 = vstv %s2307_s24  ;;  %s2476_s24 = sld [smem:[#allocation2 + $0x48]] }
  0xfb   : > { %1088 = vrot.lane.b32.xlu1 %v1083_v1, %s1763_s8  ;;  %1086 = vrot.lane.b32.xlu0 %v1082_v38, %s1763_s8  ;;  %v1205_v24 = vmul.f32 %v2255_v17, %v1204_v40  ;;  %v1222_v1 = vmul.f32 %v2246_v13, %v1220_v34  ;;  %v1236_v38 = vstv %s2326_s30  ;;  %s2486_s30 = sld [smem:[#allocation2 + $0x18]] }
  0xfc   : > { %v555_v50 = vadd.f32 %v550_v56, %v514_v58  ;;  %v554_v7 = vadd.f32 %v2091_v61, %v513_v62  ;;  %v1162_v56 = vrot.slane %v1158_v55, 1  ;;  %v1237_v57 = vmul.f32 %v2255_v17, %v1236_v38 }
  0xfd   : > { %v526_v23 = vpop.permute.xlu1 %525  ;;  %v524_v8 = vpop.permute.xlu0 %523  ;;  %v1209_v47 = vrot.slane %v1205_v24, 1  ;;  %v1238_v58 = vmul.f32 %v2246_v13, %v1236_v38  ;;  %v1336_v24 = vstv %s2365_s7 }
  0xfe   : > { %v530_v53 = vadd.f32 %v526_v23, %v482_v32  ;;  %v529_v9 = vadd.f32 %v524_v8, %v481_v35  ;;  %v1206_v32 = vmul.f32 %v2246_v13, %v1204_v40  ;;  %v672_v8 = vstv %s2343_s27  ;;  %s1590_s27 = smul.u32 48, %s2604_s16 }
  0xff   : > { %1101 = vrot.lane.b32.xlu1 %v1096_v30, %s1763_s8  ;;  %1099 = vrot.lane.b32.xlu0 %v1095_v4, %s1763_s8  ;;  %v1226_v30 = vrot.slane %v1222_v1, 1  ;;  %v1225_v4 = vrot.slane %v1221_v37, 1  ;;  %v1242_v52 = vrot.slane %v1238_v58, 1  ;;  %v673_v16 = vmul.f32 %v2102_v5, %v672_v8 }
 0x100   : > { %v567_v61 = vadd.f32 %v562_v63, %v530_v53  ;;  %v566_v45 = vadd.f32 %v2107_v6, %v529_v9  ;;  %v1190_v63 = vmul.f32 %v2246_v13, %v1188_v12  ;;  %v1163_v6 = vsel %vm403_vm0, %v1161_v33, %v1162_v56  ;;  %s215_s15 = scalar_lea.vmem %s2587_s3, %s1590_s27 }
 0x101   : > { %v579_v15 = vpop.permute.xlu1 %578  ;;  %v577_v21 = vpop.permute.xlu0 %576  ;;  %v1210_v46 = vrot.slane %v1206_v32, 1  ;;  %v1241_v53 = vrot.slane %v1237_v57, 1  ;;  %v1338_v1 = vmul.f32 %v2246_v13, %v1336_v24  ;;  %v1337_v38 = vmul.f32 %v2255_v17, %v1336_v24 }
 0x102   : > { %v583_v20 = vadd.f32 %v579_v15, %v543_v48  ;;  %v582_v10 = vadd.f32 %v577_v21, %v542_v54  ;;  %v1194_v26 = vrot.slane %v1190_v63, 1  ;;  %v667_v54 = vstv %s2331_s4  ;;  %s2493_s4 = sld [smem:[#allocation2 + $0x33]] }
 0x103   : > { %1114 = vrot.lane.b32.xlu1 %v1109_v11, %s1763_s8  ;;  %1112 = vrot.lane.b32.xlu0 %v1108_v51, %s1763_s8  ;;  %v1211_v62 = vsel %vm403_vm0, %v1209_v47, %v1210_v46  ;;  %v1227_v11 = vsel %vm403_vm0, %v1225_v4, %v1226_v30  ;;  %v668_v51 = vmul.f32 %v2102_v5, %v667_v54  ;;  %v1304_v15 = vstv %s2347_s6 }
 0x104   : > { %v1195_v42 = vsel %vm403_vm0, %v1193_v29, %v1194_v26  ;;  %v1243_v21 = vsel %vm403_vm0, %v1241_v53, %v1242_v52  ;;  %v1305_v36 = vmul.f32 %v2255_v17, %v1304_v15  ;;  %v1352_v57 = vstv %s2380_s9 }
 0x105   : > { %v595_v14 = vpop.permute.xlu1 %594  ;;  %v593_v25 = vpop.permute.xlu0 %592  ;;  %v1342_v4 = vrot.slane %v1338_v1, 2 }
 0x106   : > { %v599_v22 = vadd.f32 %v595_v14, %v555_v50  ;;  %v598_v27 = vadd.f32 %v593_v25, %v554_v7  ;;  %v669_v7 = vmul.f32 %v2097_v2, %v667_v54 }
 0x107   : > { %1166 = vrot.lane.b32.xlu1 %v1162_v56, %s1762_s21  ;;  %1164 = vrot.lane.b32.xlu0 %v1163_v6, %s1762_s21  ;;  %v1289_v56 = vmul.f32 %v2255_v17, %v1288_v44  ;;  %v1341_v44 = vrot.slane %v1337_v38, 2 }
 0x109   : > { %v611_v31 = vpop.permute.xlu1 %610  ;;  %v609_v41 = vpop.permute.xlu0 %608  ;;  %v1293_v6 = vrot.slane %v1289_v56, 2  ;;  %v1343_v56 = vsel %vm536_vm1, %v1341_v44, %v1342_v4 }
 0x10a   : > { %v615_v35 = vadd.f32 %v611_v31, %v567_v61  ;;  %v614_v0 = vadd.f32 %v609_v41, %v566_v45  ;;  %v674_v45 = vmul.f32 %v2097_v2, %v672_v8  ;;  %v1322_v31 = vmul.f32 %v2246_v13, %v1320_v60 }
 0x10b   : > { %1182 = vrot.lane.b32.xlu1 %v1178_v28, %s1762_s21  ;;  %1180 = vrot.lane.b32.xlu0 %v1179_v18, %s1762_s21  ;;  %v1306_v28 = vmul.f32 %v2246_v13, %v1304_v15  ;;  %v1321_v18 = vmul.f32 %v2255_v17, %v1320_v60 }
 0x10c   : > { %v1326_v47 = vrot.slane %v1322_v31, 2 }
 0x10d   : > { %v627_v43 = vpop.permute.xlu1 %626  ;;  %v625_v48 = vpop.permute.xlu0 %624  ;;  %v1310_v41 = vrot.slane %v1306_v28, 2  ;;  %v1325_v54 = vrot.slane %v1321_v18, 2 }
 0x10e   : > { %v631_v39 = vadd.f32 %v627_v43, %v583_v20  ;;  %v630_v49 = vadd.f32 %v625_v48, %v582_v10  ;;  %v1294_v10 = vrot.slane %v1290_v3, 2 }
 0x10f   : > { %1198 = vrot.lane.b32.xlu1 %v1194_v26, %s1762_s21  ;;  %1196 = vrot.lane.b32.xlu0 %v1195_v42, %s1762_s21  ;;  %v678_v26 = vmul.f32 %v2102_v5, %v677_v19 }
 0x110   : > { %v671_v20 = vadd.f32 %v669_v7, %v631_v39  ;;  %v670_v14 = vadd.f32 %v668_v51, %v630_v49  ;;  %v1327_v7 = vsel %vm536_vm1, %v1325_v54, %v1326_v47 }
 0x111   : > { %v643_v59 = vpop.permute.xlu1 %642  ;;  %v641_v55 = vpop.permute.xlu0 %640 }
 0x112   : > { %v647_v50 = vadd.f32 %v643_v59, %v599_v22  ;;  %v646_v23 = vadd.f32 %v641_v55, %v598_v27  ;;  %v679_v27 = vmul.f32 %v2097_v2, %v677_v19  ;;  %v1353_v55 = vmul.f32 %v2255_v17, %v1352_v57 }
 0x113   : > { %1214 = vrot.lane.b32.xlu1 %v1210_v46, %s1763_s8  ;;  %1212 = vrot.lane.b32.xlu0 %v1211_v62, %s1763_s8 }
 0x114   : > { %v676_v29 = vadd.f32 %v674_v45, %v647_v50  ;;  %v675_v34 = vadd.f32 %v673_v16, %v646_v23  ;;  %v1354_v50 = vmul.f32 %v2246_v13, %v1352_v57 }
 0x115   : > { %v659_v9 = vpop.permute.xlu1 %658  ;;  %v657_v12 = vpop.permute.xlu0 %656 }
 0x116   : > { %v663_v61 = vadd.f32 %v659_v9, %v615_v35  ;;  %v662_v33 = vadd.f32 %v657_v12, %v614_v0  ;;  %v1295_v35 = vsel %vm536_vm1, %v1293_v6, %v1294_v10  ;;  %v1309_v0 = vrot.slane %v1305_v36, 2 }
 0x117   : > { %1230 = vrot.lane.b32.xlu1 %v1226_v30, %s1763_s8  ;;  %1228 = vrot.lane.b32.xlu0 %v1227_v11, %s1763_s8  ;;  %v760_v30 = vstv %s2385_s28  ;;  %v772_v11 = vstv %s2394_s11  ;;  %v1357_v12 = vrot.slane %v1353_v55, 2 }
 0x118   : > { %v681_v46 = vadd.f32 %v679_v27, %v663_v61  ;;  %v680_v48 = vadd.f32 %v678_v26, %v662_v33  ;;  %v1311_v49 = vsel %vm536_vm1, %v1309_v0, %v1310_v41  ;;  %v761_v3 = vmul.f32 %v2102_v5, %v760_v30 }
 0x119   : > { %v690_v63 = vpop.permute.xlu1 %689  ;;  %v688_v25 = vpop.permute.xlu0 %687  ;;  %v762_v9 = vmul.f32 %v2097_v2, %v760_v30  ;;  %v1358_v61 = vrot.slane %v1354_v50, 2  ;;  %v773_v16 = vmul.f32 %v2102_v5, %v772_v11  ;;  %v774_v19 = vmul.f32 %v2097_v2, %v772_v11 }
 0x11a   : > { %v694_v22 = vadd.f32 %v690_v63, %v671_v20  ;;  %v693_v40 = vadd.f32 %v688_v25, %v670_v14  ;;  %v784_v14 = vstv %s2404_s29 }
 0x11b   : > { %1246 = vrot.lane.b32.xlu1 %v1242_v52, %s1763_s8  ;;  %1244 = vrot.lane.b32.xlu0 %v1243_v21, %s1763_s8  ;;  %v1368_v52 = vstv %s2392_s10  ;;  %v766_v60 = vrot.slane %v762_v9, 1  ;;  %v1359_v6 = vsel %vm536_vm1, %v1357_v12, %v1358_v61  ;;  %v777_v25 = vrot.slane %v773_v16, 1 }
 0x11c   : > { %v1370_v33 = vmul.f32 %v2246_v13, %v1368_v52  ;;  %v1369_v45 = vmul.f32 %v2255_v17, %v1368_v52  ;;  %v785_v31 = vmul.f32 %v2102_v5, %v784_v14  ;;  %v786_v18 = vmul.f32 %v2097_v2, %v784_v14 }
 0x11d   : > { %v703_v32 = vpop.permute.xlu1 %702  ;;  %v701_v37 = vpop.permute.xlu0 %700 }
 0x11e   : > { %v707_v42 = vadd.f32 %v703_v32, %v676_v29  ;;  %v706_v43 = vadd.f32 %v701_v37, %v675_v34  ;;  %v1374_v36 = vrot.slane %v1370_v33, 2 }
 0x11f   : > { %1298 = vrot.lane.b32.xlu1 %v1294_v10, %s1762_s21  ;;  %1296 = vrot.lane.b32.xlu0 %v1295_v35, %s1762_s21  ;;  %v765_v10 = vrot.slane %v761_v3, 1 }
 0x121   : > { %v716_v39 = vpop.permute.xlu1 %715  ;;  %v714_v59 = vpop.permute.xlu0 %713  ;;  %v767_v29 = vsel %vm403_vm0, %v765_v10, %v766_v60 }
 0x122   : > { %v720_v58 = vadd.f32 %v716_v39, %v681_v46  ;;  %v719_v62 = vadd.f32 %v714_v59, %v680_v48  ;;  %v790_v46 = vrot.slane %v786_v18, 1 }
 0x123   : > { %1314 = vrot.lane.b32.xlu1 %v1310_v41, %s1762_s21  ;;  %1312 = vrot.lane.b32.xlu0 %v1311_v49, %s1762_s21 }
 0x125   : > { %v729_v23 = vpop.permute.xlu1 %728  ;;  %v727_v8 = vpop.permute.xlu0 %726 }
 0x126   : > { %v733_v53 = vadd.f32 %v729_v23, %v694_v22  ;;  %v732_v51 = vadd.f32 %v727_v8, %v693_v40  ;;  %v1373_v22 = vrot.slane %v1369_v45, 2  ;;  %v778_v40 = vrot.slane %v774_v19, 1 }
 0x127   : > { %1330 = vrot.lane.b32.xlu1 %v1326_v47, %s1762_s21  ;;  %1328 = vrot.lane.b32.xlu0 %v1327_v7, %s1762_s21  ;;  %s1509_s21 = sld [smem:[#allocation2 + $0xf]]  ;;  %v904_v8 = vstv %s1536_s12  ;;  %v916_v45 = vstv %s1563_s18 }
 0x128   : > { %v771_v32 = vadd.f32 %v766_v60, %v733_v53  ;;  %v770_v35 = vadd.f32 %v767_v29, %v732_v51  ;;  %v1375_v41 = vsel %vm536_vm1, %v1373_v22, %v1374_v36  ;;  %v779_v37 = vsel %vm403_vm0, %v777_v25, %v778_v40 }
 0x129   : > { %v742_v15 = vpop.permute.xlu1 %741  ;;  %v740_v21 = vpop.permute.xlu0 %739  ;;  %v918_v14 = vmul.f32 %v2097_v2, %v916_v45 }
 0x12a   : > { %v746_v20 = vadd.f32 %v742_v15, %v707_v42  ;;  %v745_v63 = vadd.f32 %v740_v21, %v706_v43  ;;  %v789_v43 = vrot.slane %v785_v31, 1  ;;  %v906_v15 = vmul.f32 %v2097_v2, %v904_v8 }
 0x12b   : > { %1346 = vrot.lane.b32.xlu1 %v1342_v4, %s1763_s8  ;;  %1344 = vrot.lane.b32.xlu0 %v1343_v56, %s1763_s8  ;;  %v905_v56 = vmul.f32 %v2102_v5, %v904_v8  ;;  %v922_v29 = vrot.slane %v918_v14, 2 }
 0x12c   : > { %v783_v1 = vadd.f32 %v778_v40, %v746_v20  ;;  %v782_v39 = vadd.f32 %v779_v37, %v745_v63  ;;  %v791_v54 = vsel %vm403_vm0, %v789_v43, %v790_v46  ;;  %v910_v60 = vrot.slane %v906_v15, 2 }
 0x12d   : > { %v755_v28 = vpop.permute.xlu1 %754  ;;  %v753_v26 = vpop.permute.xlu0 %752  ;;  %v892_v44 = vstv %s1509_s21  ;;  %v909_v20 = vrot.slane %v905_v56, 2  ;;  %v917_v63 = vmul.f32 %v2102_v5, %v916_v45  ;;  %v1120_v56 = vstv %s1515_s19 }
 0x12e   : > { %v759_v27 = vadd.f32 %v755_v28, %v720_v58  ;;  %v758_v24 = vadd.f32 %v753_v26, %v719_v62  ;;  %v893_v23 = vmul.f32 %v2102_v5, %v892_v44  ;;  %v894_v7 = vmul.f32 %v2097_v2, %v892_v44 }
 0x12f   : > { %1362 = vrot.lane.b32.xlu1 %v1358_v61, %s1763_s8  ;;  %1360 = vrot.lane.b32.xlu0 %v1359_v6, %s1763_s8  ;;  %v921_v26 = vrot.slane %v917_v63, 2  ;;  %v1032_v45 = vstv %s1539_s26 }
 0x130   : > { %v795_v58 = vadd.f32 %v790_v46, %v759_v27  ;;  %v794_v62 = vadd.f32 %v791_v54, %v758_v24  ;;  %v897_v11 = vrot.slane %v893_v23, 2  ;;  %v898_v51 = vrot.slane %v894_v7, 2 }
 0x131   : > { %v807_v34 = vpop.permute.xlu1 %806  ;;  %v805_v42 = vpop.permute.xlu0 %804  ;;  %v911_v27 = vsel %vm536_vm1, %v909_v20, %v910_v60  ;;  %v923_v5 = vsel %vm536_vm1, %v921_v26, %v922_v29 }
 0x132   : > { %v811_v0 = vadd.f32 %v807_v34, %v771_v32  ;;  %v810_v47 = vadd.f32 %v805_v42, %v770_v35  ;;  %v899_v19 = vsel %vm536_vm1, %v897_v11, %v898_v51 }
 0x133   : > { %1378 = vrot.lane.b32.xlu1 %v1374_v36, %s1763_s8  ;;  %1376 = vrot.lane.b32.xlu0 %v1375_v41, %s1763_s8  ;;  %s1512_s8 = sld [smem:[#allocation2 + $0x12]] }
 0x135   : > { %v823_v38 = vpop.permute.xlu1 %822  ;;  %v821_v49 = vpop.permute.xlu0 %820 }
 0x136   : > { %v827_v48 = vadd.f32 %v823_v38, %v783_v1  ;;  %v826_v57 = vadd.f32 %v821_v49, %v782_v39 }
 0x139   : > { %v839_v59 = vpop.permute.xlu1 %838  ;;  %v837_v4 = vpop.permute.xlu0 %836 }
 0x13a   : > { %v843_v30 = vadd.f32 %v839_v59, %v795_v58  ;;  %v842_v50 = vadd.f32 %v837_v4, %v794_v62 }
 0x13d   : > { %v855_v55 = vpop.permute.xlu1 %854  ;;  %v853_v53 = vpop.permute.xlu0 %852 }
 0x13e   : > { %v859_v52 = vadd.f32 %v855_v55, %v811_v0  ;;  %v858_v3 = vadd.f32 %v853_v53, %v810_v47 }
 0x140   : > { %v903_v28 = vadd.f32 %v898_v51, %v859_v52  ;;  %v902_v22 = vadd.f32 %v899_v19, %v858_v3  ;;  %v1027_v51 = vstv %s1512_s8 }
 0x141   : > { %v871_v9 = vpop.permute.xlu1 %870  ;;  %v869_v12 = vpop.permute.xlu0 %868  ;;  %v1028_v20 = vmul.f32 %v2255_v17, %v1027_v51 }
 0x142   : > { %v875_v61 = vadd.f32 %v871_v9, %v827_v48  ;;  %v874_v33 = vadd.f32 %v869_v12, %v826_v57 }
 0x144   : > { %v915_v18 = vadd.f32 %v910_v60, %v875_v61  ;;  %v914_v32 = vadd.f32 %v911_v27, %v874_v33  ;;  %v1132_v61 = vstv %s1542_s23  ;;  %v1029_v33 = vmul.f32 %v2246_v13, %v1027_v51 }
 0x145   : > { %v887_v16 = vpop.permute.xlu1 %886  ;;  %v885_v10 = vpop.permute.xlu0 %884  ;;  %v1122_v60 = vmul.f32 %v2246_v13, %v1120_v56  ;;  %v1133_v63 = vmul.f32 %v2255_v17, %v1132_v61  ;;  %v1134_v14 = vmul.f32 %v2246_v13, %v1132_v61 }
 0x146   : > { %v891_v21 = vadd.f32 %v887_v16, %v843_v30  ;;  %v890_v6 = vadd.f32 %v885_v10, %v842_v50  ;;  %v1037_v10 = vstv %s2476_s24 }
 0x148   : > { %v927_v2 = vadd.f32 %v922_v29, %v891_v21  ;;  %v926_v42 = vadd.f32 %v923_v5, %v890_v6  ;;  %v1121_v21 = vmul.f32 %v2255_v17, %v1120_v56  ;;  %v1034_v6 = vmul.f32 %v2246_v13, %v1032_v45 }
 0x149   : > { %v939_v36 = vpop.permute.xlu1 %938  ;;  %v937_v40 = vpop.permute.xlu0 %936  ;;  %v1138_v5 = vrot.slane %v1134_v14, 1  ;;  %v1264_v56 = vstv %s2493_s4 }
 0x14a   : > { %v943_v25 = vadd.f32 %v939_v36, %v903_v28  ;;  %v942_v31 = vadd.f32 %v937_v40, %v902_v22  ;;  %v1144_v40 = vstv %s2480_s22 }
 0x14d   : > { %v955_v24 = vpop.permute.xlu1 %954  ;;  %v953_v35 = vpop.permute.xlu0 %952 }
 0x14e   : > { %v959_v34 = vadd.f32 %v955_v24, %v915_v18  ;;  %v958_v41 = vadd.f32 %v953_v35, %v914_v32  ;;  %v1125_v18 = vrot.slane %v1121_v21, 1  ;;  %v1126_v32 = vrot.slane %v1122_v60, 1 }
 0x14f   : > { %v1137_v35 = vrot.slane %v1133_v63, 1  ;;  %v1265_v21 = vmul.f32 %v2255_v17, %v1264_v56  ;;  %v1266_v63 = vmul.f32 %v2246_v13, %v1264_v56 }
 0x151   : > { %v971_v0 = vpop.permute.xlu1 %970  ;;  %v969_v43 = vpop.permute.xlu0 %968 }
 0x152   : > { %v2444_v37 = vadd.f32 %v971_v0, %v927_v2  ;;  %v2446_v46 = vadd.f32 %v969_v43, %v926_v42  ;;  %v1146_v0 = vmul.f32 %v2246_v13, %v1144_v40  ;;  %v1252_v43 = vstv %s2486_s30 }
 0x155   : > { %v987_v47 = vpop.permute.xlu1 %986  ;;  %v985_v1 = vpop.permute.xlu0 %984 }
 0x156   : > { %v991_v15 = vadd.f32 %v987_v47, %v943_v25  ;;  %v990_v19 = vadd.f32 %v985_v1, %v942_v31  ;;  %v1033_v25 = vmul.f32 %v2255_v17, %v1032_v45  ;;  %v1039_v31 = vmul.f32 %v2246_v13, %v1037_v10 }
 0x157   : > { %v1038_v1 = vmul.f32 %v2255_v17, %v1037_v10 }
 0x158   : > { %v1031_v22 = vadd.f32 %v1029_v33, %v991_v15  ;;  %v1030_v29 = vadd.f32 %v1028_v20, %v990_v19  ;;  %v1127_v15 = vsel %vm403_vm0, %v1125_v18, %v1126_v32  ;;  %v1253_v33 = vmul.f32 %v2255_v17, %v1252_v43 }
 0x159   : > { %v1003_v38 = vpop.permute.xlu1 %1002  ;;  %v1001_v39 = vpop.permute.xlu0 %1000  ;;  %v1150_v19 = vrot.slane %v1146_v0, 1 }
 0x15a   : > { %v1007_v36 = vadd.f32 %v1003_v38, %v959_v34  ;;  %v1006_v26 = vadd.f32 %v1001_v39, %v958_v41  ;;  %v1145_v34 = vmul.f32 %v2255_v17, %v1144_v40 }
 0x15c   : > { %v1036_v47 = vadd.f32 %v1034_v6, %v1007_v36  ;;  %v1149_v45 = vrot.slane %v1145_v34, 1  ;;  %v1257_v36 = vrot.slane %v1253_v33, 2 }
 0x15d   : > { %v2448_v48 = vpop.permute.xlu1 %1018  ;;  %v2450_v49 = vpop.permute.xlu0 %1016 }
 0x15e   : > { %v1023_v41 = vadd.f32 %v2448_v48, %v2444_v37  ;;  %v1254_v37 = vmul.f32 %v2246_v13, %v1252_v43  ;;  %v1151_v40 = vsel %vm403_vm0, %v1149_v45, %v1150_v19 }
 0x161   : > { %v1050_v54 = vpop.permute.xlu1 %1049  ;;  %v1048_v57 = vpop.permute.xlu0 %1047 }
 0x162   : > { %v1054_v24 = vadd.f32 %v1050_v54, %v1031_v22  ;;  %v1053_v2 = vadd.f32 %v1048_v57, %v1030_v29  ;;  %v1022_v54 = vadd.f32 %v2450_v49, %v2446_v46  ;;  %v1035_v57 = vadd.f32 %v1033_v25, %v1006_v26 }
 0x163   : > { %v1041_v46 = vadd.f32 %v1039_v31, %v1023_v41  ;;  %v1258_v22 = vrot.slane %v1254_v37, 2  ;;  %v1276_v29 = vstv %s2512_s5 }
 0x164   : > { %v1040_v10 = vadd.f32 %v1038_v1, %v1022_v54  ;;  %v1277_v34 = vmul.f32 %v2255_v17, %v1276_v29  ;;  %v1278_v0 = vmul.f32 %v2246_v13, %v1276_v29 }
 0x165   : > { %v2452_v58 = vpop.permute.xlu1 %1062  ;;  %v2454_v59 = vpop.permute.xlu0 %1060 }
 0x166   : > { %v1067_v61 = vadd.f32 %v2452_v58, %v1036_v47  ;;  %v1066_v48 = vadd.f32 %v2454_v59, %v1035_v57  ;;  %v1281_v54 = vrot.slane %v1277_v34, 2  ;;  %v1282_v13 = vrot.slane %v1278_v0, 2 }
 0x169   : > { %v2456_v62 = vpop.permute.xlu1 %1075  ;;  %v2458_v30 = vpop.permute.xlu0 %1073 }
 0x16a   : > { %v1080_v14 = vadd.f32 %v2456_v62, %v1041_v46 }
 0x16d   : > { %v1089_v4 = vpop.permute.xlu1 %1088  ;;  %v1087_v44 = vpop.permute.xlu0 %1086 }
 0x16e   : > { %v1093_v38 = vadd.f32 %v1089_v4, %v1054_v24  ;;  %v1092_v51 = vadd.f32 %v1087_v44, %v1053_v2  ;;  %v1139_v4 = vsel %vm403_vm0, %v1137_v35, %v1138_v5  ;;  %v1259_v2 = vsel %vm536_vm1, %v1257_v36, %v1258_v22 }
 0x170   : > { %v1131_v44 = vadd.f32 %v1126_v32, %v1093_v38  ;;  %v1130_v59 = vadd.f32 %v1127_v15, %v1092_v51  ;;  %v1270_v32 = vrot.slane %v1266_v63, 2 }
 0x171   : > { %v2460_v50 = vpop.permute.xlu1 %1101  ;;  %v2462_v55 = vpop.permute.xlu0 %1099 }
 0x172   : > { %v1106_v49 = vadd.f32 %v2460_v50, %v1067_v61  ;;  %v1105_v60 = vadd.f32 %v2462_v55, %v1066_v48  ;;  %v1079_v50 = vadd.f32 %v2458_v30, %v1040_v10 }
 0x174   : > { %v1143_v31 = vadd.f32 %v1138_v5, %v1106_v49  ;;  %v1142_v30 = vadd.f32 %v1139_v4, %v1105_v60 }
 0x175   : > { %v2464_v23 = vpop.permute.xlu1 %1114  ;;  %v2466_v7 = vpop.permute.xlu0 %1112 }
 0x176   : > { %v1119_v55 = vadd.f32 %v2464_v23, %v1080_v14  ;;  %v1118_v24 = vadd.f32 %v2466_v7, %v1079_v50 }
 0x178   : > { %v1154_v47 = vadd.f32 %v1151_v40, %v1118_v24 }
 0x179   : > { %v2468_v52 = vpop.permute.xlu1 %1166  ;;  %v2470_v53 = vpop.permute.xlu0 %1164 }
 0x17a   : > { %v1171_v6 = vadd.f32 %v2468_v52, %v1131_v44  ;;  %v1170_v25 = vadd.f32 %v2470_v53, %v1130_v59  ;;  %v1269_v52 = vrot.slane %v1265_v21, 2 }
 0x17d   : > { %v2472_v8 = vpop.permute.xlu1 %1182  ;;  %v2474_v3 = vpop.permute.xlu0 %1180 }
 0x17e   : > { %v1187_v35 = vadd.f32 %v2472_v8, %v1143_v31  ;;  %v1186_v23 = vadd.f32 %v2474_v3, %v1142_v30  ;;  %v1271_v8 = vsel %vm536_vm1, %v1269_v52, %v1270_v32 }
 0x181   : > { %v2478_v9 = vpop.permute.xlu1 %1198  ;;  %v2482_v11 = vpop.permute.xlu0 %1196 }
 0x182   : > { %v1202_v3 = vadd.f32 %v2482_v11, %v1154_v47  ;;  %v1283_v11 = vsel %vm536_vm1, %v1281_v54, %v1282_v13 }
 0x185   : > { %v2484_v12 = vpop.permute.xlu1 %1214  ;;  %v2489_v16 = vpop.permute.xlu0 %1212 }
 0x186   : > { %v1219_v62 = vadd.f32 %v2484_v12, %v1171_v6  ;;  %v1218_v53 = vadd.f32 %v2489_v16, %v1170_v25  ;;  %v1155_v12 = vadd.f32 %v1150_v19, %v1119_v55 }
 0x188   : > { %v1263_v7 = vadd.f32 %v1258_v22, %v1219_v62  ;;  %v1262_v1 = vadd.f32 %v1259_v2, %v1218_v53  ;;  %v1203_v38 = vadd.f32 %v2478_v9, %v1155_v12 }
 0x189   : > { %v2500_v28 = vpop.permute.xlu1 %1230  ;;  %v2504_v27 = vpop.permute.xlu0 %1228 }
 0x18a   : > { %v1235_v43 = vadd.f32 %v2500_v28, %v1187_v35  ;;  %v1234_v16 = vadd.f32 %v2504_v27, %v1186_v23 }
 0x18c   : > { %v1275_v27 = vadd.f32 %v1270_v32, %v1235_v43  ;;  %v1274_v15 = vadd.f32 %v1271_v8, %v1234_v16 }
 0x18d   : > { %v2509_v42 = vpop.permute.xlu1 %1246  ;;  %v2517_v39 = vpop.permute.xlu0 %1244 }
 0x18e   : > { %v1251_v28 = vadd.f32 %v2509_v42, %v1203_v38  ;;  %v1250_v9 = vadd.f32 %v2517_v39, %v1202_v3 }
 0x190   : > { %v1287_v45 = vadd.f32 %v1282_v13, %v1251_v28 }
 0x191   : > { %v1299_v20 = vpop.permute.xlu1 %1298  ;;  %v1297_v58 = vpop.permute.xlu0 %1296 }
 0x192   : > { %v1303_v17 = vadd.f32 %v1299_v20, %v1263_v7  ;;  %v1302_v57 = vadd.f32 %v1297_v58, %v1262_v1  ;;  %v1286_v20 = vadd.f32 %v1283_v11, %v1250_v9 }
 0x195   : > { %v1315_v26 = vpop.permute.xlu1 %1314  ;;  %v1313_v18 = vpop.permute.xlu0 %1312 }
 0x196   : > { %v1319_v37 = vadd.f32 %v1315_v26, %v1275_v27  ;;  %v1318_v48 = vadd.f32 %v1313_v18, %v1274_v15 }
 0x199   : > { %v1331_v5 = vpop.permute.xlu1 %1330  ;;  %v1329_v41 = vpop.permute.xlu0 %1328 }
 0x19a   : > { %v1335_v49 = vadd.f32 %v1331_v5, %v1287_v45  ;;  %v1334_v39 = vadd.f32 %v1329_v41, %v1286_v20 }
 0x19d   : > { %v1347_v51 = vpop.permute.xlu1 %1346  ;;  %v1345_v61 = vpop.permute.xlu0 %1344 }
 0x19e   : > { %v1351_v56 = vadd.f32 %v1347_v51, %v1303_v17  ;;  %v1350_v33 = vadd.f32 %v1345_v61, %v1302_v57 }
 0x1a0   : > { %1387 = vst.msk [vmem:[%s215_s15 + $0x8] sm:$0x3f] %vm1386_vm2, %v1351_v56 }
 0x1a1   : > { %1385 = vst.msk [vmem:[%s215_s15] sm:$0xff] %vm1384_vm3, %v1350_v33  ;;  %v1363_v4 = vpop.permute.xlu1 %1362  ;;  %v1361_v42 = vpop.permute.xlu0 %1360 }
 0x1a2   : > { %v1367_v19 = vadd.f32 %v1363_v4, %v1319_v37  ;;  %v1366_v46 = vadd.f32 %v1361_v42, %v1318_v48 }
 0x1a4   : > { %1582 = vst.msk [vmem:[%s215_s15 + $0x18] sm:$0x3f] %vm1386_vm2, %v1367_v19 }
 0x1a5   : > { %1581 = vst.msk [vmem:[%s215_s15 + $0x10] sm:$0xff] %vm1384_vm3, %v1366_v46  ;;  %v1379_v44 = vpop.permute.xlu1 %1378  ;;  %v1377_v21 = vpop.permute.xlu0 %1376 }
 0x1a6   : > { %v1383_v58 = vadd.f32 %v1379_v44, %v1335_v49  ;;  %v1382_v10 = vadd.f32 %v1377_v21, %v1334_v39 }
 0x1a8   : > { %1584 = vst.msk [vmem:[%s215_s15 + $0x28] sm:$0x3f] %vm1386_vm2, %v1383_v58 }
 0x1a9   : > { %1583 = vst.msk [vmem:[%s215_s15 + $0x20] sm:$0xff] %vm1384_vm3, %v1382_v10 }
 0x1aa PF: > { %p15_p11 = scmp.ge.s32.totalorder %s1806_s17, 4   ;;  %s2599_s12 = smov %s1747_s13 }
 0x1ab   : > { %s2600_s13 = smov %s1751_s14  ;;  %s2601_s14 = smov %s1816_s20 }
 0x1ac   : > { %s2602_s15 = smov %s1806_s17  ;;  %17 = sbr.rel (!%p15_p11) target bundleno = 5 (0x5), region = 86 }
 0x1b3   :  { %1415 = vsyncpa [#allocation3], 1 }
 0x1b4   :  { %1417 = vsyncpa [#allocation3 + $0x1], 1 }
 0x1b5   :  { %1418 = vsyncpa [#allocation4], 1 }
 0x1b6   :  { %1420 = vsyncpa [#allocation4 + $0x1], 1 }
 0x1b7   :  { %1421 = vsyncpa [#allocation5], 1 }
 0x1b8   :  { %1423 = vsyncpa [#allocation5 + $0x1], 1 }

</bundles_post_ra>
